<compile_context>
chip_gen: v7x
topology: tpu7x:2x2x1
jax: 0.10.0
libtpu: 0.0.40
codegen_flags: <defaults>
</compile_context>

<pallas_src>
import functools

import jax
import jax.numpy as jnp
from jax import lax
from jax.experimental import pallas as pl
from jax.experimental.pallas import tpu as pltpu


SUB = 128                 # in-kernel sub-tile (rows): bounds the vreg live set
LANE = 128                # lane width
MAX_FUSED_VOCAB = 4096    # above this, fall back to a wrapper-side gather


def _round_up(x, m):
    return ((x + m - 1) // m) * m


# ----------------------------------------------------------------------------
# Fused kernel: (optional in-kernel embedding gather) + cross net + MLP + head
# ----------------------------------------------------------------------------
def _dcnv2s_kernel(*refs, n_cross, mlp_group_sizes, n_sub, fuse_gather,
                   n_fields, vpad):
    it = iter(refs)
    if fuse_gather:
        idx_ref = next(it)          # (tb, F) int32  combined (offset + field*vpad) ids
        gw_ref = next(it)           # (F*vpad, D) bf16 block-diagonal gather table
    else:
        x_ref = next(it)            # (tb, D) f32 pre-gathered embeddings
    cw_ref = next(it)               # (L, D, D) bf16 cross weights (resident)
    cb_ref = next(it)               # (L, 1, D) f32 cross biases
    mlp_refs = [(next(it), next(it)) for _ in mlp_group_sizes]  # stacked (cnt,din,dout)/(cnt,1,dout)
    wout_ref = next(it)             # (1, D_last) f32 output projection row
    bout_ref = next(it)             # (1,) f32 scalar in SMEM
    out_ref = next(it)              # (1, 1, tb) f32 lane-dense transposed output row

    n_mlp_total = sum(mlp_group_sizes)
    w_row = wout_ref[...]           # hoisted out of the sub-tile loop
    b_out = bout_ref[0]             # SMEM scalar

    @pl.loop(0, n_sub)              # strip-mine the DMA tile into 128-row sub-tiles
    def _(s):
        r0 = pl.multiple_of(s * SUB, SUB)

        # ---- embedding gather (fused path): one-hot @ block-diagonal table ----
        if fuse_gather:
            idx = idx_ref[pl.ds(r0, SUB), :]                       # (SUB, F) int32
            col = lax.broadcasted_iota(jnp.int32, (SUB, n_fields * vpad), 1)
            hit = col == idx[:, 0:1]
            for f in range(1, n_fields):
                hit = jnp.logical_or(hit, col == idx[:, f:f + 1])
            onehot = jnp.where(hit, 1.0, 0.0).astype(gw_ref.dtype)  # exact 0/1 in bf16
            x0 = jnp.dot(onehot, gw_ref[...],
                         preferred_element_type=jnp.float32)        # (SUB, D) exact gather
        else:
            x0 = x_ref[pl.ds(r0, SUB), :]                            # (SUB, D) f32

        # ---- CrossNetworkV2: x <- x0 * (x @ W_i + b_i) + x (residual math in f32) ----
        x = x0
        for i in range(n_cross):
            xw = jnp.dot(x.astype(cw_ref.dtype), cw_ref[i],
                         preferred_element_type=jnp.float32)         # MXU bf16 in / f32 acc
            x = x0 * (xw + cb_ref[i]) + x                            # VPU f32

        # ---- MLP hidden layers (dropout / eval-mode BN are identities) ----
        h = x
        layer = 0
        for (w_ref, b_ref), cnt in zip(mlp_refs, mlp_group_sizes):
            for j in range(cnt):
                hj = jnp.dot(h.astype(w_ref.dtype), w_ref[j],
                             preferred_element_type=jnp.float32) + b_ref[j]
                hj = jnp.maximum(hj, 0.0)                            # ReLU in f32 (v5e-safe)
                layer += 1
                # carry inter-layer activations in bf16 (halves vreg/VMEM footprint);
                # the last hidden layer stays f32 for the final reduction.
                h = hj if layer == n_mlp_total else hj.astype(jnp.bfloat16)

        # ---- output projection: VPU/XLU reduction, stored lane-dense ----
        y = jnp.sum(h * w_row, axis=-1) + b_out                      # (SUB,) f32
        out_ref[0, 0, pl.ds(r0, SUB)] = y.astype(out_ref.dtype)


# ----------------------------------------------------------------------------
# Wrapper: batch-tiled fused call
# ----------------------------------------------------------------------------
def _dcn_pallas_call(first, params, *, fuse_gather, block_b):
    B = first.shape[0]
    cross_w, cross_b = params["cross_w"], params["cross_b"]
    L, D, _ = cross_w.shape
    mlp_groups = params["mlp_groups"]
    w_out, b_out = params["mlp_out"]

    # Tiling: >= 2 blocks so v7x megacore splits the batch; tb derived from
    # cdiv(B, n_blocks) (bounded padding), rounded to the 128-row sub-tile.
    n_blocks = max(2, pl.cdiv(B, block_b))
    tb = _round_up(pl.cdiv(B, n_blocks), SUB)
    B_pad = n_blocks * tb
    n_sub = tb // SUB
    if B_pad != B:
        first = jnp.pad(first, ((0, B_pad - B), (0, 0)))   # tiny (int32 idx) in the fused path

    in_specs, args = [], []
    if fuse_gather:
        gw = params["gather_w"]                  # (F*vpad, D) bf16
        F = first.shape[1]
        vpad = gw.shape[0] // F
        in_specs += [pl.BlockSpec((tb, F), lambda i: (i, 0)),
                     pl.BlockSpec(gw.shape, lambda i: (0, 0))]
        args += [first, gw]
    else:
        F, vpad = 0, 0
        in_specs += [pl.BlockSpec((tb, D), lambda i: (i, 0))]
        args += [first]

    # Weights use constant index_maps -> DMA'd once, stay VMEM-resident across tiles.
    in_specs += [pl.BlockSpec(cross_w.shape, lambda i: (0, 0, 0)),
                 pl.BlockSpec(cross_b.shape, lambda i: (0, 0, 0))]
    args += [cross_w, cross_b]
    mlp_group_sizes = []
    for (w, b) in mlp_groups:
        in_specs += [pl.BlockSpec(w.shape, lambda i: (0, 0, 0)),
                     pl.BlockSpec(b.shape, lambda i: (0, 0, 0))]
        args += [w, b]
        mlp_group_sizes.append(w.shape[0])
    in_specs += [pl.BlockSpec(w_out.shape, lambda i: (0, 0)),
                 pl.BlockSpec(memory_space=pltpu.MemorySpace.SMEM)]   # scalar b_out
    args += [w_out, b_out]

    kernel = functools.partial(
        _dcnv2s_kernel, n_cross=L, mlp_group_sizes=tuple(mlp_group_sizes),
        n_sub=n_sub, fuse_gather=fuse_gather, n_fields=F, vpad=vpad)

    # Advisory cost estimate for XLA's scheduler around the custom call.
    flops_per_row = 2 * D + L * 2 * D * D
    if fuse_gather:
        flops_per_row += 2 * F * vpad * D
    for (w, _) in mlp_groups:
        cnt, din, dout = w.shape
        flops_per_row += cnt * 2 * din * dout
    bytes_accessed = sum(int(a.size) * a.dtype.itemsize for a in args) + B_pad * 4
    cost = pl.CostEstimate(flops=int(B_pad * flops_per_row), transcendentals=0,
                           bytes_accessed=int(bytes_accessed))

    out_full = pl.pallas_call(
        kernel,
        out_shape=jax.ShapeDtypeStruct((n_blocks, 1, tb), jnp.float32),
        grid=(n_blocks,),
        in_specs=in_specs,
        out_specs=pl.BlockSpec((1, 1, tb), lambda i: (i, 0, 0)),
        compiler_params=pltpu.CompilerParams(
            dimension_semantics=("parallel",),   # both v7x TCs split the batch grid
        ),
        cost_estimate=cost,
    )(*args)

    # (n_blocks, 1, tb) -> flat padded batch -> (B, 1)
    return out_full.reshape(-1)[:B].reshape(B, 1)


def dcnv2s_forward(params, x_idx, *, block_b=2048):
    if "gather_w" in params:
        # Fused-gather path: only the int32 indices travel through HBM.
        F = x_idx.shape[1]
        vpad = params["gather_w"].shape[0] // F
        shift = params["offsets"] + vpad * jnp.arange(F, dtype=jnp.int32)
        idx_comb = x_idx.astype(jnp.int32) + shift[None, :]          # (B, F)
        return _dcn_pallas_call(idx_comb, params, fuse_gather=True, block_b=block_b)
    # TODO(synk): large-vocab fallback keeps the gather in XLA (jnp.take); an in-kernel
    #             DMA row-gather from an HBM-resident table would remove this round trip.
    idx = x_idx + params["offsets"][None, :]
    x_embed = jnp.take(params["embedding"], idx, axis=0)
    x_embed = x_embed.reshape(x_idx.shape[0], -1).astype(jnp.float32)
    return _dcn_pallas_call(x_embed, params, fuse_gather=False, block_b=block_b)


# ----------------------------------------------------------------------------
# DCNV2S parameters (synthetic, deterministic)
# ----------------------------------------------------------------------------
def init_dcnv2s_params(key, field_dims, embed_dim, cn_layers, mlp_layers):
    num_fields = len(field_dims)
    vocab = int(sum(field_dims))
    embed_out = num_fields * embed_dim

    keys = jax.random.split(key, 4 + 2 * len(mlp_layers))
    k_iter = iter(keys)

    params = {}
    # Embedding values rounded to bf16 so the in-kernel bf16 gather table reproduces
    # the f32 reference gather exactly.
    emb = 0.05 * jax.random.normal(next(k_iter), (vocab, embed_dim), dtype=jnp.float32)
    emb = emb.astype(jnp.bfloat16).astype(jnp.float32)
    params["embedding"] = emb
    params["offsets"] = jnp.array(
        [0] + list(jnp.cumsum(jnp.array(field_dims[:-1])).tolist()), dtype=jnp.int32)

    # Block-diagonal gather table: row (f*vpad + v), cols [f*E, (f+1)*E) hold emb[v].
    if vocab <= MAX_FUSED_VOCAB:
        vpad = _round_up(vocab, LANE)
        gw = jnp.zeros((num_fields * vpad, embed_out), dtype=jnp.float32)
        for f in range(num_fields):
            gw = gw.at[f * vpad:f * vpad + vocab,
                       f * embed_dim:(f + 1) * embed_dim].set(emb)
        params["gather_w"] = gw.astype(jnp.bfloat16)

    # Cross network: stacked (L, D, D) bf16 weights, (L, 1, D) f32 biases.
    params["cross_w"] = (0.05 * jax.random.normal(
        next(k_iter), (cn_layers, embed_out, embed_out), dtype=jnp.float32)
    ).astype(jnp.bfloat16)
    params["cross_b"] = jnp.zeros((cn_layers, 1, embed_out), dtype=jnp.float32)

    # MLP hidden layers; consecutive equal-shape layers are stacked into one
    # (cnt, din, dout) ref (fewer in_specs / DMA descriptors, one resident buffer).
    layer_w, layer_b = [], []
    d_in = embed_out
    for d_out in mlp_layers:
        w = (0.05 * jax.random.normal(next(k_iter), (d_in, d_out), dtype=jnp.float32)
             ).astype(jnp.bfloat16)
        b = 0.01 * jax.random.normal(next(k_iter), (1, d_out), dtype=jnp.float32)
        layer_w.append(w)
        layer_b.append(b)
        d_in = d_out
    groups, i = [], 0
    while i < len(layer_w):
        j = i
        while j + 1 < len(layer_w) and layer_w[j + 1].shape == layer_w[i].shape:
            j += 1
        groups.append((jnp.stack(layer_w[i:j + 1]), jnp.stack(layer_b[i:j + 1])))
        i = j + 1
    params["mlp_groups"] = groups

    w_out = 0.05 * jax.random.normal(next(k_iter), (1, d_in), dtype=jnp.float32)
    b_out = jnp.zeros((1,), dtype=jnp.float32)
    params["mlp_out"] = (w_out, b_out)
    return params


# ----------------------------------------------------------------------------
# Pure-JAX f32 reference (weights de-quantized from bf16) for a sanity check
# ----------------------------------------------------------------------------
def dcnv2s_reference(params, x_idx):
    idx = x_idx + params["offsets"][None, :]
    x = jnp.take(params["embedding"], idx, axis=0)
    x = x.reshape(x_idx.shape[0], -1).astype(jnp.float32)

    x0 = x
    cw = params["cross_w"].astype(jnp.float32)
    for i in range(cw.shape[0]):
        x = x0 * (x @ cw[i] + params["cross_b"][i]) + x

    h = x
    for (w, b) in params["mlp_groups"]:
        wf = w.astype(jnp.float32)
        for j in range(w.shape[0]):
            h = jnp.maximum(h @ wf[j] + b[j], 0.0)
    w_out, b_out = params["mlp_out"]
    return jnp.sum(h * w_out, axis=-1, keepdims=True) + b_out[0]


# ----------------------------------------------------------------------------
if __name__ == "__main__":
    # 4 sparse fields, embed_dim=32 -> embed_output_dim = 128; batch = 8;
    # cn_layers = 3; mlp = (128, 128, 128).
    field_dims = [10, 20, 30, 40]
    embed_dim = 32
    cn_layers = 3
    mlp_layers = (128, 128, 128)
    batch = 8

    key = jax.random.PRNGKey(0)
    k_param, k_x = jax.random.split(key)
    params = init_dcnv2s_params(k_param, field_dims, embed_dim, cn_layers, mlp_layers)

    # Integer feature-index input, shape (batch, num_fields)
    field_keys = jax.random.split(k_x, len(field_dims))
    x_idx = jnp.stack(
        [jax.random.randint(fk, (batch,), 0, fd, dtype=jnp.int32)
         for fk, fd in zip(field_keys, field_dims)],
        axis=1,
    )  # (8, 4)

    fwd = jax.jit(functools.partial(dcnv2s_forward, block_b=2048))
    pred = jax.block_until_ready(fwd(params, x_idx))

    ref = dcnv2s_reference(params, x_idx)
    assert pred.shape == (batch, 1)
    # bf16 matmul inputs (f32 accumulate) vs f32 reference -> loose but tight-enough tol.
    assert jnp.allclose(pred, ref, atol=2e-3, rtol=2e-2), "mismatch vs reference"

    print("KERNEL_OK")
</pallas_src>

<mosaic_0001>
module attributes {stable_mosaic.version = 11 : i64} {
  func.func @_dcnv2s_kernel(%arg0: i32, %arg1: memref<128x4xi32, #tpu.memory_space<vmem>>, %arg2: memref<512x128xbf16, #tpu.memory_space<vmem>>, %arg3: memref<3x128x128xbf16, #tpu.memory_space<vmem>>, %arg4: memref<3x1x128xf32, #tpu.memory_space<vmem>>, %arg5: memref<3x128x128xbf16, #tpu.memory_space<vmem>>, %arg6: memref<3x1x128xf32, #tpu.memory_space<vmem>>, %arg7: memref<1x128xf32, #tpu.memory_space<vmem>>, %arg8: memref<1xf32, #tpu.memory_space<smem>>, %arg9: memref<1x1x128xf32, #tpu.memory_space<vmem>>) attributes {dimension_semantics = [#tpu.dimension_semantics<parallel>], iteration_bounds = array<i64: 2>, scalar_prefetch = 0 : i64, scratch_operands = 0 : i64, tpu.core_type = #tpu.core_type<tc>, window_params = [{transform_indices = @transform_0, window_bounds = array<i64: 128, 4>}, {pipeline_mode = #tpu.pipeline_mode<synchronous>, transform_indices = @transform_1, window_bounds = array<i64: 512, 128>}, {pipeline_mode = #tpu.pipeline_mode<synchronous>, transform_indices = @transform_2, window_bounds = array<i64: 3, 128, 128>}, {pipeline_mode = #tpu.pipeline_mode<synchronous>, transform_indices = @transform_3, window_bounds = array<i64: 3, 1, 128>}, {pipeline_mode = #tpu.pipeline_mode<synchronous>, transform_indices = @transform_4, window_bounds = array<i64: 3, 128, 128>}, {pipeline_mode = #tpu.pipeline_mode<synchronous>, transform_indices = @transform_5, window_bounds = array<i64: 3, 1, 128>}, {pipeline_mode = #tpu.pipeline_mode<synchronous>, transform_indices = @transform_6, window_bounds = array<i64: 1, 128>}, {transform_indices = @transform_7, window_bounds = array<i64: 1>}, {transform_indices = @transform_8, window_bounds = array<i64: 1, 1, 128>}]} {
    %c0 = arith.constant 0 : index
    %c0_0 = arith.constant 0 : index
    %0 = vector.load %arg7[%c0, %c0_0] : memref<1x128xf32, #tpu.memory_space<vmem>>, vector<1x128xf32>
    %c0_1 = arith.constant 0 : index
    %1 = memref.load %arg8[%c0_1] : memref<1xf32, #tpu.memory_space<smem>>
    %c0_i32 = arith.constant 0 : i32
    %c1_i32 = arith.constant 1 : i32
    %2 = arith.muli %c0_i32, %c1_i32 : i32
    %c0_i32_2 = arith.constant 0 : i32
    %3 = arith.addi %c0_i32_2, %2 : i32
    %c128_i32 = arith.constant 128 : i32
    %4 = arith.muli %3, %c128_i32 : i32
    %5 = tpu.assume_multiple %4, 128 : i32
    %6 = arith.index_cast %5 : i32 to index
    %c0_3 = arith.constant 0 : index
    %7 = vector.load %arg1[%6, %c0_3] : memref<128x4xi32, #tpu.memory_space<vmem>>, vector<128x4xi32>
    %8 = tpu.iota {dimensions = array<i32: 1>} : vector<128x512xi32>
    %9 = vector.extract_strided_slice %7 {offsets = [0, 0], sizes = [128, 1], strides = [1, 1]} : vector<128x4xi32> to vector<128x1xi32>
    %10 = vector.broadcast %9 : vector<128x1xi32> to vector<128x512xi32>
    %11 = arith.cmpi eq, %8, %10 : vector<128x512xi32>
    %12 = vector.extract_strided_slice %7 {offsets = [0, 1], sizes = [128, 1], strides = [1, 1]} : vector<128x4xi32> to vector<128x1xi32>
    %13 = vector.broadcast %12 : vector<128x1xi32> to vector<128x512xi32>
    %14 = arith.cmpi eq, %8, %13 : vector<128x512xi32>
    %15 = arith.ori %11, %14 : vector<128x512xi1>
    %16 = vector.extract_strided_slice %7 {offsets = [0, 2], sizes = [128, 1], strides = [1, 1]} : vector<128x4xi32> to vector<128x1xi32>
    %17 = vector.broadcast %16 : vector<128x1xi32> to vector<128x512xi32>
    %18 = arith.cmpi eq, %8, %17 : vector<128x512xi32>
    %19 = arith.ori %15, %18 : vector<128x512xi1>
    %20 = vector.extract_strided_slice %7 {offsets = [0, 3], sizes = [128, 1], strides = [1, 1]} : vector<128x4xi32> to vector<128x1xi32>
    %21 = vector.broadcast %20 : vector<128x1xi32> to vector<128x512xi32>
    %22 = arith.cmpi eq, %8, %21 : vector<128x512xi32>
    %23 = arith.ori %19, %22 : vector<128x512xi1>
    %cst = arith.constant 1.000000e+00 : f32
    %cst_4 = arith.constant 0.000000e+00 : f32
    %24 = vector.broadcast %cst : f32 to vector<128x512xf32>
    %25 = vector.broadcast %cst_4 : f32 to vector<128x512xf32>
    %26 = arith.select %23, %24, %25 : vector<128x512xi1>, vector<128x512xf32>
    %27 = arith.truncf %26 : vector<128x512xf32> to vector<128x512xbf16>
    %c0_5 = arith.constant 0 : index
    %c0_6 = arith.constant 0 : index
    %28 = vector.load %arg2[%c0_5, %c0_6] : memref<512x128xbf16, #tpu.memory_space<vmem>>, vector<512x128xbf16>
    %cst_7 = arith.constant dense<0.000000e+00> : vector<128x128xf32>
    %29 = tpu.matmul %27, %28, %cst_7 {dimension_numbers = #tpu.dot_dimension_numbers<[1], [0], [0], [1], [0, 0, 1, 1], [], []>} : vector<128x512xbf16>, vector<512x128xbf16>, vector<128x128xf32> -> vector<128x128xf32>
    %30 = arith.truncf %29 : vector<128x128xf32> to vector<128x128xbf16>
    %c0_8 = arith.constant 0 : index
    %c0_9 = arith.constant 0 : index
    %c0_10 = arith.constant 0 : index
    %31 = vector.load %arg3[%c0_8, %c0_9, %c0_10] : memref<3x128x128xbf16, #tpu.memory_space<vmem>>, vector<1x128x128xbf16>
    %32 = vector.shape_cast %31 : vector<1x128x128xbf16> to vector<128x128xbf16>
    %cst_11 = arith.constant dense<0.000000e+00> : vector<128x128xf32>
    %33 = tpu.matmul %30, %32, %cst_11 {dimension_numbers = #tpu.dot_dimension_numbers<[1], [0], [0], [1], [0, 0, 1, 1], [], []>} : vector<128x128xbf16>, vector<128x128xbf16>, vector<128x128xf32> -> vector<128x128xf32>
    %c0_12 = arith.constant 0 : index
    %c0_13 = arith.constant 0 : index
    %c0_14 = arith.constant 0 : index
    %34 = vector.load %arg4[%c0_12, %c0_13, %c0_14] : memref<3x1x128xf32, #tpu.memory_space<vmem>>, vector<1x1x128xf32>
    %35 = vector.shape_cast %34 : vector<1x1x128xf32> to vector<1x128xf32>
    %36 = vector.broadcast %35 : vector<1x128xf32> to vector<128x128xf32>
    %37 = arith.addf %33, %36 : vector<128x128xf32>
    %38 = arith.mulf %29, %37 : vector<128x128xf32>
    %39 = arith.addf %38, %29 : vector<128x128xf32>
    %40 = arith.truncf %39 : vector<128x128xf32> to vector<128x128xbf16>
    %c1 = arith.constant 1 : index
    %c0_15 = arith.constant 0 : index
    %c0_16 = arith.constant 0 : index
    %41 = vector.load %arg3[%c1, %c0_15, %c0_16] : memref<3x128x128xbf16, #tpu.memory_space<vmem>>, vector<1x128x128xbf16>
    %42 = vector.shape_cast %41 : vector<1x128x128xbf16> to vector<128x128xbf16>
    %cst_17 = arith.constant dense<0.000000e+00> : vector<128x128xf32>
    %43 = tpu.matmul %40, %42, %cst_17 {dimension_numbers = #tpu.dot_dimension_numbers<[1], [0], [0], [1], [0, 0, 1, 1], [], []>} : vector<128x128xbf16>, vector<128x128xbf16>, vector<128x128xf32> -> vector<128x128xf32>
    %c1_18 = arith.constant 1 : index
    %c0_19 = arith.constant 0 : index
    %c0_20 = arith.constant 0 : index
    %44 = vector.load %arg4[%c1_18, %c0_19, %c0_20] : memref<3x1x128xf32, #tpu.memory_space<vmem>>, vector<1x1x128xf32>
    %45 = vector.shape_cast %44 : vector<1x1x128xf32> to vector<1x128xf32>
    %46 = vector.broadcast %45 : vector<1x128xf32> to vector<128x128xf32>
    %47 = arith.addf %43, %46 : vector<128x128xf32>
    %48 = arith.mulf %29, %47 : vector<128x128xf32>
    %49 = arith.addf %48, %39 : vector<128x128xf32>
    %50 = arith.truncf %49 : vector<128x128xf32> to vector<128x128xbf16>
    %c2 = arith.constant 2 : index
    %c0_21 = arith.constant 0 : index
    %c0_22 = arith.constant 0 : index
    %51 = vector.load %arg3[%c2, %c0_21, %c0_22] : memref<3x128x128xbf16, #tpu.memory_space<vmem>>, vector<1x128x128xbf16>
    %52 = vector.shape_cast %51 : vector<1x128x128xbf16> to vector<128x128xbf16>
    %cst_23 = arith.constant dense<0.000000e+00> : vector<128x128xf32>
    %53 = tpu.matmul %50, %52, %cst_23 {dimension_numbers = #tpu.dot_dimension_numbers<[1], [0], [0], [1], [0, 0, 1, 1], [], []>} : vector<128x128xbf16>, vector<128x128xbf16>, vector<128x128xf32> -> vector<128x128xf32>
    %c2_24 = arith.constant 2 : index
    %c0_25 = arith.constant 0 : index
    %c0_26 = arith.constant 0 : index
    %54 = vector.load %arg4[%c2_24, %c0_25, %c0_26] : memref<3x1x128xf32, #tpu.memory_space<vmem>>, vector<1x1x128xf32>
    %55 = vector.shape_cast %54 : vector<1x1x128xf32> to vector<1x128xf32>
    %56 = vector.broadcast %55 : vector<1x128xf32> to vector<128x128xf32>
    %57 = arith.addf %53, %56 : vector<128x128xf32>
    %58 = arith.mulf %29, %57 : vector<128x128xf32>
    %59 = arith.addf %58, %49 : vector<128x128xf32>
    %60 = arith.truncf %59 : vector<128x128xf32> to vector<128x128xbf16>
    %c0_27 = arith.constant 0 : index
    %c0_28 = arith.constant 0 : index
    %c0_29 = arith.constant 0 : index
    %61 = vector.load %arg5[%c0_27, %c0_28, %c0_29] : memref<3x128x128xbf16, #tpu.memory_space<vmem>>, vector<1x128x128xbf16>
    %62 = vector.shape_cast %61 : vector<1x128x128xbf16> to vector<128x128xbf16>
    %cst_30 = arith.constant dense<0.000000e+00> : vector<128x128xf32>
    %63 = tpu.matmul %60, %62, %cst_30 {dimension_numbers = #tpu.dot_dimension_numbers<[1], [0], [0], [1], [0, 0, 1, 1], [], []>} : vector<128x128xbf16>, vector<128x128xbf16>, vector<128x128xf32> -> vector<128x128xf32>
    %c0_31 = arith.constant 0 : index
    %c0_32 = arith.constant 0 : index
    %c0_33 = arith.constant 0 : index
    %64 = vector.load %arg6[%c0_31, %c0_32, %c0_33] : memref<3x1x128xf32, #tpu.memory_space<vmem>>, vector<1x1x128xf32>
    %65 = vector.shape_cast %64 : vector<1x1x128xf32> to vector<1x128xf32>
    %66 = vector.broadcast %65 : vector<1x128xf32> to vector<128x128xf32>
    %67 = arith.addf %63, %66 : vector<128x128xf32>
    %cst_34 = arith.constant 0.000000e+00 : f32
    %68 = vector.broadcast %cst_34 : f32 to vector<128x128xf32>
    %69 = arith.maximumf %67, %68 : vector<128x128xf32>
    %70 = arith.truncf %69 : vector<128x128xf32> to vector<128x128xbf16>
    %c1_35 = arith.constant 1 : index
    %c0_36 = arith.constant 0 : index
    %c0_37 = arith.constant 0 : index
    %71 = vector.load %arg5[%c1_35, %c0_36, %c0_37] : memref<3x128x128xbf16, #tpu.memory_space<vmem>>, vector<1x128x128xbf16>
    %72 = vector.shape_cast %71 : vector<1x128x128xbf16> to vector<128x128xbf16>
    %cst_38 = arith.constant dense<0.000000e+00> : vector<128x128xf32>
    %73 = tpu.matmul %70, %72, %cst_38 {dimension_numbers = #tpu.dot_dimension_numbers<[1], [0], [0], [1], [0, 0, 1, 1], [], []>} : vector<128x128xbf16>, vector<128x128xbf16>, vector<128x128xf32> -> vector<128x128xf32>
    %c1_39 = arith.constant 1 : index
    %c0_40 = arith.constant 0 : index
    %c0_41 = arith.constant 0 : index
    %74 = vector.load %arg6[%c1_39, %c0_40, %c0_41] : memref<3x1x128xf32, #tpu.memory_space<vmem>>, vector<1x1x128xf32>
    %75 = vector.shape_cast %74 : vector<1x1x128xf32> to vector<1x128xf32>
    %76 = vector.broadcast %75 : vector<1x128xf32> to vector<128x128xf32>
    %77 = arith.addf %73, %76 : vector<128x128xf32>
    %cst_42 = arith.constant 0.000000e+00 : f32
    %78 = vector.broadcast %cst_42 : f32 to vector<128x128xf32>
    %79 = arith.maximumf %77, %78 : vector<128x128xf32>
    %80 = arith.truncf %79 : vector<128x128xf32> to vector<128x128xbf16>
    %c2_43 = arith.constant 2 : index
    %c0_44 = arith.constant 0 : index
    %c0_45 = arith.constant 0 : index
    %81 = vector.load %arg5[%c2_43, %c0_44, %c0_45] : memref<3x128x128xbf16, #tpu.memory_space<vmem>>, vector<1x128x128xbf16>
    %82 = vector.shape_cast %81 : vector<1x128x128xbf16> to vector<128x128xbf16>
    %cst_46 = arith.constant dense<0.000000e+00> : vector<128x128xf32>
    %83 = tpu.matmul %80, %82, %cst_46 {dimension_numbers = #tpu.dot_dimension_numbers<[1], [0], [0], [1], [0, 0, 1, 1], [], []>} : vector<128x128xbf16>, vector<128x128xbf16>, vector<128x128xf32> -> vector<128x128xf32>
    %c2_47 = arith.constant 2 : index
    %c0_48 = arith.constant 0 : index
    %c0_49 = arith.constant 0 : index
    %84 = vector.load %arg6[%c2_47, %c0_48, %c0_49] : memref<3x1x128xf32, #tpu.memory_space<vmem>>, vector<1x1x128xf32>
    %85 = vector.shape_cast %84 : vector<1x1x128xf32> to vector<1x128xf32>
    %86 = vector.broadcast %85 : vector<1x128xf32> to vector<128x128xf32>
    %87 = arith.addf %83, %86 : vector<128x128xf32>
    %cst_50 = arith.constant 0.000000e+00 : f32
    %88 = vector.broadcast %cst_50 : f32 to vector<128x128xf32>
    %89 = arith.maximumf %87, %88 : vector<128x128xf32>
    %90 = vector.broadcast %0 : vector<1x128xf32> to vector<128x128xf32>
    %91 = arith.mulf %89, %90 : vector<128x128xf32>
    %cst_51 = arith.constant dense<0.000000e+00> : vector<128xf32>
    %92 = vector.multi_reduction <add>, %91, %cst_51 [1] : vector<128x128xf32> to vector<128xf32>
    %93 = vector.broadcast %1 : f32 to vector<128xf32>
    %94 = arith.addf %92, %93 : vector<128xf32>
    %c0_52 = arith.constant 0 : index
    %c0_53 = arith.constant 0 : index
    %95 = arith.index_cast %5 : i32 to index
    %96 = vector.load %arg9[%c0_52, %c0_53, %95] : memref<1x1x128xf32, #tpu.memory_space<vmem>>, vector<1x1x128xf32>
    %97 = vector.shape_cast %96 : vector<1x1x128xf32> to vector<128xf32>
    %98 = vector.shape_cast %94 : vector<128xf32> to vector<1x1x128xf32>
    tpu.vector_store %arg9[%c0_52, %c0_53, %95], %98 {strides = array<i32>} : memref<1x1x128xf32, #tpu.memory_space<vmem>>, vector<1x1x128xf32>,
    %c1_i32_54 = arith.constant 1 : i32
    return
  }
  func.func @transform_0(%arg0: i32) -> (i32, i32) {
    %c0_i32 = arith.constant 0 : i32
    %c0_i32_0 = arith.constant 0 : i32
    return %arg0, %c0_i32 : i32, i32
  }
  func.func @transform_1(%arg0: i32) -> (i32, i32) {
    %c0_i32 = arith.constant 0 : i32
    %c0_i32_0 = arith.constant 0 : i32
    %c0_i32_1 = arith.constant 0 : i32
    return %c0_i32, %c0_i32_0 : i32, i32
  }
  func.func @transform_2(%arg0: i32) -> (i32, i32, i32) {
    %c0_i32 = arith.constant 0 : i32
    %c0_i32_0 = arith.constant 0 : i32
    %c0_i32_1 = arith.constant 0 : i32
    %c0_i32_2 = arith.constant 0 : i32
    return %c0_i32, %c0_i32_0, %c0_i32_1 : i32, i32, i32
  }
  func.func @transform_3(%arg0: i32) -> (i32, i32, i32) {
    %c0_i32 = arith.constant 0 : i32
    %c0_i32_0 = arith.constant 0 : i32
    %c0_i32_1 = arith.constant 0 : i32
    %c0_i32_2 = arith.constant 0 : i32
    return %c0_i32, %c0_i32_0, %c0_i32_1 : i32, i32, i32
  }
  func.func @transform_4(%arg0: i32) -> (i32, i32, i32) {
    %c0_i32 = arith.constant 0 : i32
    %c0_i32_0 = arith.constant 0 : i32
    %c0_i32_1 = arith.constant 0 : i32
    %c0_i32_2 = arith.constant 0 : i32
    return %c0_i32, %c0_i32_0, %c0_i32_1 : i32, i32, i32
  }
  func.func @transform_5(%arg0: i32) -> (i32, i32, i32) {
    %c0_i32 = arith.constant 0 : i32
    %c0_i32_0 = arith.constant 0 : i32
    %c0_i32_1 = arith.constant 0 : i32
    %c0_i32_2 = arith.constant 0 : i32
    return %c0_i32, %c0_i32_0, %c0_i32_1 : i32, i32, i32
  }
  func.func @transform_6(%arg0: i32) -> (i32, i32) {
    %c0_i32 = arith.constant 0 : i32
    %c0_i32_0 = arith.constant 0 : i32
    %c0_i32_1 = arith.constant 0 : i32
    return %c0_i32, %c0_i32_0 : i32, i32
  }
  func.func @transform_7(%arg0: i32) -> i32 {
    %c0_i32 = arith.constant 0 : i32
    %c0_i32_0 = arith.constant 0 : i32
    return %c0_i32 : i32
  }
  func.func @transform_8(%arg0: i32) -> (i32, i32, i32) {
    %c0_i32 = arith.constant 0 : i32
    %c0_i32_0 = arith.constant 0 : i32
    %c0_i32_1 = arith.constant 0 : i32
    return %arg0, %c0_i32, %c0_i32_0 : i32, i32, i32
  }
}

</mosaic_0001>

<bundles_post_ra>
// kernel: dcnv2s_forward.1
= control target key start
LH: loop header
LB: loop body
LE: loop exit
PB: predicated region body
PF: predicated region fallthrough
CT: control target
= control target key end

     0   :  { %s5461_s0 = inlined_call_operand.vmem [shape: s32[256,4], index: 0, kind: input, shape index: {}]   ;;  %s5462_s1 = inlined_call_operand.vmem [shape: bf16[512,128], index: 1, kind: input, shape index: {}]   ;;  %s5463_s2 = inlined_call_operand.hbm [shape: bf16[3,128,128], index: 2, kind: input, shape index: {}]   ;;  %s5464_s3 = inlined_call_operand.vmem [shape: f32[3,1,128], index: 3, kind: input, shape index: {}]   ;;  %s5465_s4 = inlined_call_operand.hbm [shape: bf16[3,128,128], index: 4, kind: input, shape index: {}]   ;;  %s5466_s5 = inlined_call_operand.vmem [shape: f32[3,1,128], index: 5, kind: input, shape index: {}]   ;;  %s5467_s6 = inlined_call_operand.vmem [shape: f32[1,128], index: 6, kind: input, shape index: {}]   ;;  %s5468_s7 = inlined_call_operand.<no memory space> [shape: f32[1], index: 7, kind: input, shape index: {}]   ;;  %s5469_s8 = inlined_call_operand.vmem [shape: f32[2,1,128], index: 8, kind: output, shape index: {}]  }
   0x1   :  { %13 = sst [smem:[#allocation2]] %s5468_s7 }
   0x2   :  { %14 = vsyncpa [#allocation4], 0 }
   0x3   :  { %15 = vsyncpa [#allocation6], 0  ;;  %s3889_s29 = smov 0  }
   0x4 LB: > { %s3895_s30 = sadd.s32 4294967295, %s3830_s29   ;;  %p3022_p0 = scmp.ge.s32.totalorder %s3830_s29, 1  ;;  %s3830_s29 = sphi %s3889_s29, %s21_s29  }
   0x5   : > { %p225_p1 = scmp.lt.s32.totalorder %s3830_s29, 3  ;;  %s3832_s9 = smov [#allocation3]  }
   0x6   : > { %s240_s7 = sshll.u32 %s3832_s9, 4  ;;  %p5470_p3 = scmp.eq.s32.totalorder %s3895_s30, 0  ;;  %s241_s7 = int_to_ptr.vmem [resolvable:$true] %s240_s7 }
   0x7   : > { %p3899_p2 = pnand %p3022_p0, %p225_p1  ;;  %s3833_s11 = smov [#allocation5]  }
   0x8   : > { %s256_s12 = sshll.u32 %s3833_s11, 4  ;;  %s3760_s16 = scalar_lea.hbm %s5463_s2, 3072  ;;  %s3912_s12 = int_to_ptr.vmem [resolvable:$true] %s256_s12 }
   0x9   : > { %s5472_s10 = scalar_select %p3899_p2, 1, 0 }
   0xa   : > { %p3612_p4 = pneg %p3899_p2  ;;  %p3761_p6 = scmp.ne.s32.totalorder %s5463_s2, %s3760_s16 }
   0xb   : > { %p3767_p10 = scmp.lt.u32.totalorder %s3760_s16, %s5463_s2 }
   0xc   : > { %p3908_p5 = pnand %p5470_p3, %p3612_p4 }
   0xe   : > { %p3762_p7 = pneg %p3908_p5 }
  0x10   : > { %p3763_p8 = pnand %p3762_p7, %p3761_p6 }
  0x12   : > { %p3764_p9 = pneg %p3763_p8 }
  0x14   : > { %p3769_p11 = pnand %p3767_p10, %p3764_p9 }
  0x16   : > { %3772 = shalt.err (!%p3769_p11)
}
  0x17   : > { %s3773_s21 = scalar_lea.vmem %s241_s7, 3072  ;;  %p3781_p1 = scmp.lt.s32.totalorder %s241_s7, %s241_s7 }
  0x18   : > { %p3774_p12 = scmp.ne.s32.totalorder %s241_s7, %s3773_s21  ;;  %p3782_p4 = scmp.lt.s32.totalorder %s3773_s21, %s3773_s21 }
  0x1a   : > { %p3776_p13 = pnand %p3774_p12, %p3762_p7  ;;  %p3783_p3 = por %p3782_p4, %p3781_p1 }
  0x1c   : > { %p3777_p0 = pneg %p3776_p13 }
  0x1e   : > { %p3784_p2 = pnand %p3783_p3, %p3777_p0 }
  0x20   : > { %3787 = shalt.err (!%p3784_p2)
}
  0x21   : > { %s3834_s22 = smov 64   ;;  %s3835_s23 = smov 4  }
  0x22   : > { %3615 = dma.hbm_to_vmem [thread:$0]  (!%p3908_p5), %s5463_s2, 3072, %s241_s7, [#allocation4], %s3834_s22, %s3834_s22, %s3835_s23  }
  0x23   : > { %s3788_s28 = scalar_lea.hbm %s5465_s4, 3072 }
  0x24   : > { %p3789_p6 = scmp.ne.s32.totalorder %s5465_s4, %s3788_s28  ;;  %p3795_p8 = scmp.lt.u32.totalorder %s3788_s28, %s5465_s4 }
  0x26   : > { %p3791_p2 = pnand %p3789_p6, %p3762_p7 }
  0x28   : > { %p3792_p3 = pneg %p3791_p2 }
  0x2a   : > { %p3797_p9 = pnand %p3795_p8, %p3792_p3 }
  0x2c   : > { %3800 = shalt.err (!%p3797_p9)
}
  0x2d   : > { %s3801_s7 = scalar_lea.vmem %s3912_s12, 3072  ;;  %p3809_p13 = scmp.lt.s32.totalorder %s3912_s12, %s3912_s12 }
  0x2e   : > { %p3802_p10 = scmp.ne.s32.totalorder %s3912_s12, %s3801_s7  ;;  %p3810_p0 = scmp.lt.s32.totalorder %s3801_s7, %s3801_s7 }
  0x30   : > { %p3804_p11 = pnand %p3802_p10, %p3762_p7  ;;  %p3811_p1 = por %p3810_p0, %p3809_p13 }
  0x32   : > { %p3805_p12 = pneg %p3804_p11 }
  0x34   : > { %p3812_p4 = pnand %p3811_p1, %p3805_p12 }
  0x36   : > { %3815 = shalt.err (!%p3812_p4)
}
  0x37   : > { %3618 = dma.hbm_to_vmem [thread:$0]  (!%p3908_p5), %s5465_s4, 3072, %s3912_s12, [#allocation6], %s3834_s22, %s3834_s22, %s3835_s23  }
  0x38   : > { %p5474_p6 = scmp.ne.s32.totalorder %s5472_s10, 0 }
  0x39   : > { %p5475_p2 = scmp.eq.s32.totalorder (!%p5474_p6), %s3895_s30, 0 }
  0x3a   : > { %290 = sbr.rel (%p5474_p6) target bundleno = 2177 (0x881), region = 52 }
  0x41   : > { %3821 = dma.done.wait (%p5475_p2), [#allocation4], 3072   ;;  %p5476_p7 = pmov %p5475_p2 }
  0x42   : > { %p5477_p3 = pmov %p5475_p2 }
  0x43   : > { %3823 = vsyncadd (%p5476_p7), [#allocation4], 4294964224 }
  0x44   : > { %3825 = dma.done.wait (%p5477_p3), [#allocation6], 3072   ;;  %p5478_p8 = pmov %p5475_p2 }
  0x45   : > { %s3029_s13 = sshll.u32 %s3895_s30, 4  ;;  %v3836_v0 = vmov 2   ;;  %v3837_v1 = vmov 1   ;;  %v3838_v5 = vmov 3   ;;  %v3680_v9 = vld [vmem:[%s5462_s1 + $0x40] sm:$0xff]   ;;  %v3839_v13 = vmov 0  }
  0x46   : > { %3827 = vsyncadd (%p5478_p8), [#allocation6], 4294964224  ;;  %3641 = vset.pattern.permute.xlu0 %v3836_v0  ;;  %3640 = vset.pattern.permute.xlu1 %v3837_v1  ;;  %p327_p5 = scmp.lt.s32.totalorder %s3029_s13, 31  ;;  %v3681_v10 = vld [vmem:[%s5462_s1 + $0xc0] sm:$0xff]   ;;  %v3684_v14 = vld [vmem:[%s5462_s1 + $0x48] sm:$0xff]   ;;  %p332_p9 = scmp.lt.s32.totalorder %s3895_s30, 1 }
  0x47   : > { %3188 = vmatprep.subr.bf16.mxu0 %v3680_v9  ;;  %3252 = vmatprep.subr.bf16.mxu1 %v3681_v10  ;;  %v3682_v11 = vld [vmem:[%s5462_s1] sm:$0xff]   ;;  %v3685_v15 = vld [vmem:[%s5462_s1 + $0xc8] sm:$0xff]   ;;  %v3688_v19 = vld [vmem:[%s5462_s1 + $0x50] sm:$0xff]  }
  0x48   : > { %s5530_s13 = smov (!%p327_p5, %s3029_s13), 31  ;;  %v3683_v12 = vld [vmem:[%s5462_s1 + $0x80] sm:$0xff]   ;;  %3189 = vmatpush3.bf16.msra.mxu0 %v3682_v11  ;;  %v3686_v16 = vld [vmem:[%s5462_s1 + $0x8] sm:$0xff]   ;;  %v3689_v20 = vld [vmem:[%s5462_s1 + $0xd0] sm:$0xff]   ;;  %s5532_s30 = smov (!%p332_p9, %s3895_s30), 1 }
  0x49   : > { %s3030_s10 = sshll.u32 %s5530_s13, 3  ;;  %3253 = vmatpush3.bf16.msra.mxu1 %v3683_v12  ;;  %v3687_v17 = vld [vmem:[%s5462_s1 + $0x88] sm:$0xff]   ;;  %3190 = vmatprep.subr.bf16.mxu0 %v3684_v14  ;;  %v3690_v21 = vld [vmem:[%s5462_s1 + $0x10] sm:$0xff]   ;;  %v3692_v24 = vld [vmem:[%s5462_s1 + $0x58] sm:$0xff]   ;;  %s334_s20 = scalar_lea.vmem %s5469_s8, %s5532_s30 }
  0x4a   : > { %s3977_s19 = scalar_lea.vmem %s5461_s0, %s3030_s10  ;;  %3254 = vmatprep.subr.bf16.mxu1 %v3685_v15  ;;  %v3691_v22 = vld [vmem:[%s5462_s1 + $0x90] sm:$0xff]   ;;  %v3693_v25 = vld [vmem:[%s5462_s1 + $0xd8] sm:$0xff]   ;;  %v3696_v29 = vld [vmem:[%s5462_s1 + $0x60] sm:$0xff]   ;;  %s337_s10 = sld [smem:[#allocation2]] }
  0x4b   : > { %v3980_v2 = vld [vmem:[%s3977_s19] sm:$0xff]  ;;  %v3985_v3 = vld [vmem:[%s3977_s19 + $0x18] sm:$0xff]  ;;  %v3988_v4 = vld [vmem:[%s3977_s19 + $0x8] sm:$0xff] }
  0x4c   : > { %648 = vperm.xlu0 %3641, %v3980_v2   ;;  %472 = vperm.xlu1 %3640, %v3980_v2   ;;  %v3995_v6 = vld [vmem:[%s3977_s19 + $0x20] sm:$0xff]  ;;  %v4000_v7 = vld [vmem:[%s3977_s19 + $0x38] sm:$0xff]  ;;  %v4006_v8 = vld [vmem:[%s3977_s19 + $0x10] sm:$0xff] }
  0x4d   : > { %v4037_v18 = vld [vmem:[%s3977_s19 + $0x28] sm:$0xff]  ;;  %3191 = vmatpush3.bf16.msra.mxu0 %v3686_v16  ;;  %3255 = vmatpush3.bf16.msra.mxu1 %v3687_v17  ;;  %v4054_v23 = vld [vmem:[%s3977_s19 + $0x40] sm:$0xff]  ;;  %v3694_v26 = vld [vmem:[%s5462_s1 + $0x18] sm:$0xff]  }
  0x4e   : > { %3192 = vmatprep.subr.bf16.mxu0 %v3688_v19  ;;  %3256 = vmatprep.subr.bf16.mxu1 %v3689_v20  ;;  %v3695_v27 = vld [vmem:[%s5462_s1 + $0x98] sm:$0xff]   ;;  %v3697_v30 = vld [vmem:[%s5462_s1 + $0xe0] sm:$0xff]   ;;  %v3700_v33 = vld [vmem:[%s5462_s1 + $0x68] sm:$0xff]   ;;  %v3840_v20 = vmov 1.0|1.0  }
  0x4f   : > { %v4072_v28 = vld [vmem:[%s3977_s19 + $0x58] sm:$0xff]  ;;  %v3698_v31 = vld [vmem:[%s5462_s1 + $0x20] sm:$0xff]   ;;  %v3701_v34 = vld [vmem:[%s5462_s1 + $0xe8] sm:$0xff]  }
  0x50   : > { %657 = vperm.xlu0 %3641, %v3985_v3   ;;  %475 = vperm.xlu1 %3640, %v3988_v4   ;;  %v3699_v32 = vld [vmem:[%s5462_s1 + $0xa0] sm:$0xff]   ;;  %v3702_v35 = vld [vmem:[%s5462_s1 + $0x28] sm:$0xff]   ;;  %v3704_v37 = vld [vmem:[%s5462_s1 + $0x70] sm:$0xff]  }
  0x51   : > { %3193 = vmatpush3.bf16.msra.mxu0 %v3690_v21  ;;  %3257 = vmatpush3.bf16.msra.mxu1 %v3691_v22  ;;  %v3703_v36 = vld [vmem:[%s5462_s1 + $0xa8] sm:$0xff]   ;;  %v3705_v38 = vld [vmem:[%s5462_s1 + $0xf0] sm:$0xff]   ;;  %v3708_v41 = vld [vmem:[%s5462_s1 + $0x78] sm:$0xff]  }
  0x52   : > { %3194 = vmatprep.subr.bf16.mxu0 %v3692_v24  ;;  %3258 = vmatprep.subr.bf16.mxu1 %v3693_v25  ;;  %v3706_v39 = vld [vmem:[%s5462_s1 + $0x30] sm:$0xff]   ;;  %v3709_v42 = vld [vmem:[%s5462_s1 + $0xf8] sm:$0xff]   ;;  %v4140_v46 = vld [vmem:[%s3977_s19 + $0x68] sm:$0xff]  ;;  %v5491_v24 = vmov 0 }
  0x53   : > { %v3707_v40 = vld [vmem:[%s5462_s1 + $0xb0] sm:$0xff]   ;;  %v3710_v43 = vld [vmem:[%s5462_s1 + $0x38] sm:$0xff]   ;;  %v347_v48 = vld [vmem:[%s3977_s19 + $0x48] sm:$0xff] }
  0x54   : > { %3647 = vset.pattern.permute.xlu0 %v3838_v5  ;;  %3642 = vset.pattern.permute.xlu1 %v3836_v0  ;;  %v3711_v44 = vld [vmem:[%s5462_s1 + $0xb8] sm:$0xff]   ;;  %v348_v45 = vld [vmem:[%s3977_s19 + $0x50] sm:$0xff]  ;;  %v4152_v49 = vld [vmem:[%s3977_s19 + $0x60] sm:$0xff] }
  0x55   : > { %827 = vperm.xlu0 %3647, %v3988_v4   ;;  %651 = vperm.xlu1 %3642, %v3988_v4   ;;  %v344_v47 = vld [vmem:[%s3977_s19 + $0x30] sm:$0xff]  ;;  %v4169_v51 = vld [vmem:[%s3977_s19 + $0x78] sm:$0xff] }
  0x56   : > { %3195 = vmatpush3.bf16.msra.mxu0 %v3694_v26  ;;  %3259 = vmatpush3.bf16.msra.mxu1 %v3695_v27  ;;  %v4161_v50 = vld [vmem:[%s3977_s19 + $0x70] sm:$0xff]  ;;  %v5494_v26 = vmov 0 }
  0x57   : > { %3196 = vmatprep.subr.bf16.mxu0 %v3696_v29  ;;  %3260 = vmatprep.subr.bf16.mxu1 %v3697_v30 }
  0x59   : > { %836 = vperm.xlu0 %3647, %v3995_v6   ;;  %3643 = vset.pattern.permute.xlu1 %v3838_v5 }
  0x5a   : > { %824 = vperm.xlu1 %3643, %v3980_v2   ;;  %3197 = vmatpush3.bf16.msra.mxu0 %v3698_v31 }
  0x5b   : > { %3261 = vmatpush3.bf16.msra.mxu1 %v3699_v32  ;;  %3198 = vmatprep.subr.bf16.mxu0 %v3700_v33  ;;  %v5507_v32 = vmov 0  ;;  %v5511_v33 = vmov 0 }
  0x5c   : > { %3262 = vmatprep.subr.bf16.mxu1 %v3701_v34 }
  0x5d   : > { %845 = vperm.xlu0 %3647, %v4000_v7  }
  0x5e   : > { %3644 = vset.pattern.permute.xlu1 %v3839_v13  ;;  %3199 = vmatpush3.bf16.msra.mxu0 %v3702_v35 }
  0x5f   : > { %366 = vperm.xlu1 %3644, %v4006_v8   ;;  %3263 = vmatpush3.bf16.msra.mxu1 %v3703_v36 }
  0x60   : > { %3200 = vmatprep.subr.bf16.mxu0 %v3704_v37  ;;  %3264 = vmatprep.subr.bf16.mxu1 %v3705_v38 }
  0x61   : > { %3657 = vset.pattern.permute.xlu0 %v3837_v1 }
  0x62   : > { %478 = vperm.xlu0 %3657, %v4006_v8   ;;  %3201 = vmatpush3.bf16.msra.mxu0 %v3706_v39 }
  0x63   : > { %369 = vperm.xlu1 %3644, %v3985_v3   ;;  %3265 = vmatpush3.bf16.msra.mxu1 %v3707_v40 }
  0x64   : > { %3202 = vmatprep.subr.bf16.mxu0 %v3708_v41  ;;  %3266 = vmatprep.subr.bf16.mxu1 %v3709_v42 }
  0x66   : > { %487 = vperm.xlu0 %3657, %v4037_v18   ;;  %3203 = vmatpush3.bf16.msra.mxu0 %v3710_v43 }
  0x67   : > { %3645 = vset.pattern.permute.xlu1 %v3837_v1  ;;  %3267 = vmatpush3.bf16.msra.mxu1 %v3711_v44 }
  0x68   : > { %481 = vperm.xlu1 %3645, %v3985_v3  }
  0x6a   : > { %496 = vperm.xlu0 %3657, %v4054_v23  }
  0x6c   : > { %3646 = vset.pattern.permute.xlu1 %v3836_v0 }
  0x6d   : > { %654 = vperm.xlu1 %3646, %v4006_v8  }
  0x6e   : > { %505 = vperm.xlu0 %3657, %v4072_v28  }
  0x71   : > { %3648 = vset.pattern.permute.xlu1 %v3838_v5 }
  0x72   : > { %3664 = vset.pattern.permute.xlu0 %v3839_v13  ;;  %830 = vperm.xlu1 %3648, %v4006_v8  }
  0x73   : > { %360 = vperm.xlu0 %3664, %v3980_v2  }
  0x76   : > { %833 = vperm.xlu1 %3648, %v3985_v3   ;;  %v354_v3 = vlaneseq }
  0x77   : > { %363 = vperm.xlu0 %3664, %v3988_v4  }
  0x7a   : > { %3649 = vset.pattern.permute.xlu1 %v3839_v13 }
  0x7b   : > { %375 = vperm.xlu1 %3649, %v4037_v18   ;;  %372 = vperm.xlu0 %3664, %v3995_v6  }
  0x7f   : > { %3650 = vset.pattern.permute.xlu1 %v3837_v1  ;;  %381 = vperm.xlu0 %3664, %v4000_v7  }
  0x80   : > { %484 = vperm.xlu1 %3650, %v3995_v6  }
  0x83   : > { %390 = vperm.xlu0 %3664, %v348_v45  }
  0x84   : > { %3651 = vset.pattern.permute.xlu1 %v3836_v0 }
  0x85   : > { %660 = vperm.xlu1 %3651, %v3995_v6  }
  0x87   : > { %399 = vperm.xlu0 %3664, %v4140_v46  }
  0x89   : > { %663 = vperm.xlu1 %3651, %v4037_v18  }
  0x8b   : > { %3668 = vset.pattern.permute.xlu0 %v3836_v0 }
  0x8c   : > { %666 = vperm.xlu0 %3668, %v344_v47  }
  0x8d   : > { %3652 = vset.pattern.permute.xlu1 %v3838_v5 }
  0x8e   : > { %839 = vperm.xlu1 %3652, %v4037_v18  }
  0x90   : > { %675 = vperm.xlu0 %3668, %v347_v48  }
  0x92   : > { %3653 = vset.pattern.permute.xlu1 %v3839_v13 }
  0x93   : > { %378 = vperm.xlu1 %3653, %v344_v47  }
  0x94   : > { %684 = vperm.xlu0 %3668, %v4152_v49  }
  0x97   : > { %3654 = vset.pattern.permute.xlu1 %v3837_v1 }
  0x98   : > { %490 = vperm.xlu1 %3654, %v344_v47   ;;  %3670 = vset.pattern.permute.xlu0 %v3838_v5 }
  0x99   : > { %854 = vperm.xlu0 %3670, %v348_v45  }
  0x9c   : > { %493 = vperm.xlu1 %3654, %v4000_v7  }
  0x9d   : > { %863 = vperm.xlu0 %3670, %v4140_v46  }
  0xa0   : > { %3655 = vset.pattern.permute.xlu1 %v3836_v0 }
  0xa1   : > { %669 = vperm.xlu1 %3655, %v4000_v7   ;;  %3674 = vset.pattern.permute.xlu0 %v3837_v1  ;;  %v4224_v7 = vand.u32 127, %v354_v3 }
  0xa2   : > { %514 = vperm.xlu0 %3674, %v4161_v50  }
  0xa3   : > { %v4233_v10 = vadd.s32 128, %v4224_v7  ;;  %v4239_v12 = vadd.s32 384, %v4224_v7 }
  0xa5   : > { %3656 = vset.pattern.permute.xlu1 %v3838_v5 }
  0xa6   : > { %842 = vperm.xlu1 %3656, %v344_v47   ;;  %3677 = vset.pattern.permute.xlu0 %v3836_v0 }
  0xa7   : > { %693 = vperm.xlu0 %3677, %v4169_v51  }
  0xaa   : > { %3658 = vset.pattern.permute.xlu1 %v3839_v13 }
  0xab   : > { %384 = vperm.xlu1 %3658, %v4054_v23   ;;  %3679 = vset.pattern.permute.xlu0 %v3838_v5 }
  0xaf   : > { %387 = vperm.xlu1 %3658, %v347_v48  }
  0xb3   : > { %3659 = vset.pattern.permute.xlu1 %v3837_v1 }
  0xb4   : > { %499 = vperm.xlu1 %3659, %v347_v48  }
  0xb8   : > { %3660 = vset.pattern.permute.xlu1 %v3836_v0 }
  0xb9   : > { %672 = vperm.xlu1 %3660, %v4054_v23  }
  0xbd   : > { %3661 = vset.pattern.permute.xlu1 %v3838_v5 }
  0xbe   : > { %848 = vperm.xlu1 %3661, %v4054_v23  }
  0xc2   : > { %851 = vperm.xlu1 %3661, %v347_v48  }
  0xc6   : > { %3662 = vset.pattern.permute.xlu1 %v3839_v13 }
  0xc7   : > { %393 = vperm.xlu1 %3662, %v4072_v28  }
  0xcb   : > { %3663 = vset.pattern.permute.xlu1 %v3837_v1  ;;  %v4184_v52 = vpop.permute.xlu1 %472  ;;  %v4186_v53 = vpop.permute.xlu0 %648 }
  0xcc   : > { %502 = vperm.xlu1 %3663, %v348_v45   ;;  %vm696_vm0 = vcmp.eq.s32.totalorder %v4233_v10, %v4186_v53  ;;  %vm520_vm3 = vcmp.eq.s32.totalorder %v4233_v10, %v4184_v52  ;;  %vm522_vm10 = vcmp.eq.s32.totalorder %v4239_v12, %v4184_v52 }
  0xcf   : > { %v4188_v54 = vpop.permute.xlu1 %475  ;;  %v4190_v55 = vpop.permute.xlu0 %657 }
  0xd0   : > { %3665 = vset.pattern.permute.xlu1 %v3836_v0  ;;  %vm524_vm13 = vcmp.eq.s32.totalorder %v4233_v10, %v4188_v54 }
  0xd1   : > { %678 = vperm.xlu1 %3665, %v348_v45  }
  0xd4   : > { %v4193_v56 = vpop.permute.xlu1 %651  ;;  %v4195_v57 = vpop.permute.xlu0 %827 }
  0xd5   : > { %681 = vperm.xlu1 %3665, %v4072_v28   ;;  %vm876_vm14 = vcmp.eq.s32.totalorder %v4233_v10, %v4195_v57 }
  0xd8   : > { %v4198_v58 = vpop.permute.xlu0 %836 }
  0xd9   : > { %3666 = vset.pattern.permute.xlu1 %v3838_v5  ;;  %v4201_v59 = vpop.permute.xlu1 %824 }
  0xda   : > { %857 = vperm.xlu1 %3666, %v4072_v28   ;;  %vm872_vm8 = vcmp.eq.s32.totalorder %v4233_v10, %v4201_v59  ;;  %v4397_v28 = vadd.s32 256, %v4224_v7 }
  0xdc   : > { %v4204_v60 = vpop.permute.xlu0 %845 }
  0xde   : > { %3667 = vset.pattern.permute.xlu1 %v3839_v13  ;;  %v4207_v61 = vpop.permute.xlu1 %366 }
  0xdf   : > { %396 = vperm.xlu1 %3667, %v4152_v49   ;;  %vm416_vm6 = vcmp.eq.s32.totalorder %v4233_v10, %v4207_v61 }
  0xe1   : > { %v4210_v62 = vpop.permute.xlu0 %478 }
  0xe2   : > { %v4212_v63 = vpop.permute.xlu1 %369  ;;  %vm528_vm1 = vcmp.eq.s32.totalorder %v4233_v10, %v4210_v62 }
  0xe3   : > { %3669 = vset.pattern.permute.xlu1 %v3837_v1  ;;  %vm4269_vm11 = vmor %vm416_vm6, %vm528_vm1  ;;  %vm700_vm1 = vcmp.eq.s32.totalorder %v4233_v10, %v4193_v56 }
  0xe4   : > { %508 = vperm.xlu1 %3669, %v4152_v49  }
  0xe5   : > { %v4216_v2 = vpop.permute.xlu0 %487 }
  0xe7   : > { %v4218_v4 = vpop.permute.xlu1 %481 }
  0xe8   : > { %511 = vperm.xlu1 %3669, %v4140_v46  }
  0xe9   : > { %v4221_v6 = vpop.permute.xlu0 %496 }
  0xec   : > { %3671 = vset.pattern.permute.xlu1 %v3836_v0  ;;  %v4227_v8 = vpop.permute.xlu1 %654 }
  0xed   : > { %687 = vperm.xlu1 %3671, %v4140_v46   ;;  %v4230_v9 = vpop.permute.xlu0 %505 }
  0xf1   : > { %3672 = vset.pattern.permute.xlu1 %v3838_v5  ;;  %v4236_v11 = vpop.permute.xlu1 %830 }
  0xf2   : > { %v4241_v14 = vpop.permute.xlu0 %360  ;;  %860 = vperm.xlu1 %3672, %v4152_v49  }
  0xf3   : > { %vm408_vm2 = vcmp.eq.s32.totalorder %v4233_v10, %v4241_v14  ;;  %vm410_vm5 = vcmp.eq.s32.totalorder %v4239_v12, %v4241_v14 }
  0xf4   : > { %vm584_vm4 = vmor %vm408_vm2, %vm520_vm3  ;;  %vm532_vm2 = vcmp.eq.s32.totalorder %v4233_v10, %v4218_v4 }
  0xf5   : > { %v4256_v15 = vpop.permute.xlu1 %833  ;;  %vm760_vm7 = vmor %vm584_vm4, %vm696_vm0 }
  0xf6   : > { %v4260_v16 = vpop.permute.xlu0 %363  ;;  %3673 = vset.pattern.permute.xlu1 %v3839_v13  ;;  %vm4263_vm9 = vmor %vm760_vm7, %vm872_vm8  ;;  %vm420_vm7 = vcmp.eq.s32.totalorder %v4233_v10, %v4212_v63 }
  0xf7   : > { %402 = vperm.xlu1 %3673, %v4161_v50   ;;  %vm412_vm12 = vcmp.eq.s32.totalorder %v4233_v10, %v4260_v16  ;;  %vm4280_vm15 = vmor %vm410_vm5, %vm522_vm10  ;;  %vm414_vm4 = vcmp.eq.s32.totalorder %v4239_v12, %v4260_v16  ;;  %vm698_vm5 = vcmp.eq.s32.totalorder %v4239_v12, %v4186_v53  ;;  %vm526_vm10 = vcmp.eq.s32.totalorder %v4239_v12, %v4188_v54 }
  0xf8   : > { %vm588_vm0 = vmor %vm412_vm12, %vm524_vm13  ;;  %vm534_vm12 = vcmp.eq.s32.totalorder %v4239_v12, %v4218_v4  ;;  %vm704_vm13 = vcmp.eq.s32.totalorder %v4233_v10, %v4227_v8 }
  0xf9   : > { %vm764_vm3 = vmor %vm588_vm0, %vm700_vm1  ;;  %vm702_vm1 = vcmp.eq.s32.totalorder %v4239_v12, %v4193_v56 }
  0xfa   : > { %v4290_v19 = vpop.permute.xlu1 %375  ;;  %vm940_vm6 = vmor %vm764_vm3, %vm876_vm14  ;;  %v4549_v39 = vpop.permute.xlu0 %372 }
  0xfb   : > { %405 = vperm.xlu1 %3673, %v4169_v51   ;;  %vm3063_vm8 = vmpackc.low %vm940_vm6, %vm4263_vm9  ;;  %vm878_vm6 = vcmp.eq.s32.totalorder %v4239_v12, %v4195_v57  ;;  %vm407_vm9 = vcmp.eq.s32.totalorder %v4224_v7, %v4241_v14 }
  0xfc   : > { %3064 = vmatprep.mubr.msk.bf16.mxu0 %vm3063_vm8, %v3840_v20  ;;  %vm590_vm14 = vmor %vm414_vm4, %vm526_vm10  ;;  %vm422_vm4 = vcmp.eq.s32.totalorder %v4239_v12, %v4212_v63  ;;  %vm531_vm10 = vcmp.eq.s32.totalorder %v4224_v7, %v4218_v4 }
  0xfd   : > { %vm4309_vm0 = vmor %vm420_vm7, %vm532_vm2  ;;  %vm874_vm2 = vcmp.eq.s32.totalorder %v4239_v12, %v4201_v59  ;;  %vm418_vm7 = vcmp.eq.s32.totalorder %v4239_v12, %v4207_v61 }
  0xfe   : > { %vm762_vm3 = vmor %vm4280_vm15, %vm698_vm5  ;;  %v4593_v43 = vpop.permute.xlu0 %381 }
  0xff   : > { %vm766_vm8 = vmor %vm590_vm14, %vm702_vm1  ;;  %3675 = vset.pattern.permute.xlu1 %v3837_v1  ;;  %v4352_v25 = vpop.permute.xlu1 %484  ;;  %vm419_vm1 = vcmp.eq.s32.totalorder %v4224_v7, %v4212_v63  ;;  %v5496_v1 = vmov 0 }
 0x100   : > { %vm4331_vm15 = vmor %vm762_vm3, %vm874_vm2  ;;  %vm5493_vm3 = vcmp.eq.s32.totalorder %v4239_v12, %v4210_v62  ;;  %517 = vperm.xlu1 %3675, %v4169_v51  }
 0x101   : > { %vm4340_vm5 = vmor %vm4269_vm11, %vm704_vm13  ;;  %vm411_vm11 = vcmp.eq.s32.totalorder %v4224_v7, %v4260_v16 }
 0x102   : > { %vm4347_vm14 = vmor %vm422_vm4, %vm534_vm12  ;;  %vm519_vm12 = vcmp.eq.s32.totalorder %v4224_v7, %v4184_v52  ;;  %vm695_vm4 = vcmp.eq.s32.totalorder %v4224_v7, %v4186_v53  ;;  %v4612_v45 = vpop.permute.xlu0 %390 }
 0x103   : > { %v5492_v24 = vsel %vm4347_vm14, 4294967295, %v5491_v24  ;;  %vm942_vm13 = vmor %vm766_vm8, %vm878_vm6  ;;  %vm523_vm8 = vcmp.eq.s32.totalorder %v4224_v7, %v4188_v54 }
 0x104   : > { %vm4361_vm2 = vmor %vm418_vm7, %vm5493_vm3  ;;  %vm415_vm7 = vcmp.eq.s32.totalorder %v4224_v7, %v4207_v61  ;;  %3676 = vset.pattern.permute.xlu1 %v3836_v0  ;;  %v4406_v29 = vpop.permute.xlu1 %660 }
 0x105   : > { %v5495_v26 = vsel %vm4361_vm2, 4294967295, %v5494_v26  ;;  %vm3095_vm6 = vmpackc.low %vm942_vm13, %vm4331_vm15  ;;  %vm5498_vm13 = vcmp.eq.s32.totalorder %v4224_v7, %v4210_v62  ;;  %690 = vperm.xlu1 %3676, %v4161_v50  }
 0x106   : > { %3096 = vmatprep.mubr.msk.bf16.mxu1 %vm3095_vm6, %v3840_v20  ;;  %vm583_vm3 = vmor %vm407_vm9, %vm519_vm12  ;;  %vm708_vm9 = vcmp.eq.s32.totalorder %v4233_v10, %v4190_v55  ;;  %vm871_vm6 = vcmp.eq.s32.totalorder %v4224_v7, %v4201_v59  ;;  %v4629_v47 = vpop.permute.xlu0 %399 }
 0x107   : > { %vm4385_vm14 = vmor %vm419_vm1, %vm531_vm10  ;;  %vm699_vm10 = vcmp.eq.s32.totalorder %v4224_v7, %v4193_v56 }
 0x108   : > { %v5497_v1 = vsel %vm4385_vm14, 4294967295, %v5496_v1  ;;  %vm587_vm15 = vmor %vm411_vm11, %vm523_vm8  ;;  %vm875_vm11 = vcmp.eq.s32.totalorder %v4224_v7, %v4195_v57  ;;  %vm880_vm8 = vcmp.eq.s32.totalorder %v4233_v10, %v4236_v11  ;;  %v4440_v31 = vpop.permute.xlu1 %663 }
 0x109   : > { %vm4392_vm2 = vmor %vm415_vm7, %vm5498_vm13  ;;  %vm521_vm7 = vcmp.eq.s32.totalorder %v4397_v28, %v4184_v52  ;;  %3678 = vset.pattern.permute.xlu1 %v3838_v5  ;;  %v5515_v5 = vmov 0 }
 0x10a   : > { %vm759_vm1 = vmor %vm583_vm3, %vm695_vm4  ;;  %vm409_vm4 = vcmp.eq.s32.totalorder %v4397_v28, %v4241_v14  ;;  %866 = vperm.xlu1 %3678, %v4161_v50  }
 0x10b   : > { %vm763_vm12 = vmor %vm587_vm15, %vm699_vm10  ;;  %vm413_vm15 = vcmp.eq.s32.totalorder %v4397_v28, %v4260_v16  ;;  %v4646_v49 = vpop.permute.xlu0 %666  ;;  %v3719_v16 = vld [vmem:[#allocation3 + $0x38] sm:$0xff]  }
 0x10c   : > { %vm935_vm3 = vmor %vm759_vm1, %vm871_vm6  ;;  %vm5509_vm1 = vcmp.eq.s32.totalorder %v4239_v12, %v4190_v55 }
 0x10d   : > { %vm939_vm10 = vmor %vm763_vm12, %vm875_vm11  ;;  %vm5505_vm12 = vcmp.eq.s32.totalorder %v4239_v12, %v4227_v8  ;;  %v4504_v35 = vpop.permute.xlu1 %839 }
 0x10e   : > { %vm4426_vm14 = vmor %vm4309_vm0, %vm708_vm9  ;;  %vm525_vm0 = vcmp.eq.s32.totalorder %v4397_v28, %v4188_v54  ;;  %vm5510_vm9 = vnez %v5492_v24  ;;  %869 = vperm.xlu1 %3678, %v4169_v51   ;;  %v3713_v54 = vld [vmem:[#allocation3 + $0x8] sm:$0xff]  }
 0x10f   : > { %vm3065_vm6 = vmpackc.low %vm939_vm10, %vm935_vm3  ;;  %vm5506_vm3 = vnez %v5495_v26 }
 0x110   : > { %vm4436_vm13 = vmor %vm4340_vm5, %vm880_vm8  ;;  %3066 = vmatmul.mubr.msk.bf16.vlgmr.msra.gmra.mrb[0].mxu0 %vm3065_vm6, %v3840_v20  ;;  %vm5514_vm8 = vcmp.eq.s32.totalorder %v4224_v7, %v4227_v8 }
 0x111   : > { %vm585_vm11 = vmor %vm409_vm4, %vm521_vm7  ;;  %vm701_vm7 = vcmp.eq.s32.totalorder %v4397_v28, %v4193_v56  ;;  %v3714_v56 = vld [vmem:[#allocation3 + $0x10] sm:$0xff]  }
 0x112   : > { %vm4452_vm5 = vmor %vm5506_vm3, %vm5505_vm12  ;;  %vm877_vm12 = vcmp.eq.s32.totalorder %v4397_v28, %v4195_v57  ;;  %vm873_vm3 = vcmp.eq.s32.totalorder %v4397_v28, %v4201_v59  ;;  %v4534_v38 = vpop.permute.xlu1 %378  ;;  %v4730_v59 = vpop.permute.xlu0 %675 }
 0x113   : > { %v5508_v32 = vsel %vm4452_vm5, 4294967295, %v5507_v32  ;;  %vm589_vm10 = vmor %vm413_vm15, %vm525_vm0  ;;  %vm5513_vm15 = vcmp.eq.s32.totalorder %v4397_v28, %v4186_v53  ;;  %v3712_v53 = vld [vmem:[#allocation3] sm:$0xff]  }
 0x114   : > { %vm4463_vm6 = vmor %vm5510_vm9, %vm5509_vm1  ;;  %vm529_vm1 = vcmp.eq.s32.totalorder %v4397_v28, %v4210_v62  ;;  %3412 = vmatprep.subr.bf16.mxu0 %v3712_v53 }
 0x115   : > { %v5512_v33 = vsel %vm4463_vm6, 4294967295, %v5511_v33  ;;  %vm761_vm0 = vmor %vm585_vm11, %vm5513_vm15  ;;  %vm421_vm11 = vcmp.eq.s32.totalorder %v4397_v28, %v4212_v63  ;;  %vm884_vm6 = vcmp.eq.s32.totalorder %v4233_v10, %v4256_v15  ;;  %3413 = vmatpush3.bf16.msra.mxu0 %v3712_v53 }
 0x116   : > { %vm765_vm9 = vmor %vm589_vm10, %vm701_vm7  ;;  %vm5517_vm10 = vcmp.eq.s32.totalorder %v4224_v7, %v4190_v55  ;;  %vm5518_vm7 = vnez %v5497_v1  ;;  %3414 = vmatprep.subr.bf16.mxu0 %v3713_v54 }
 0x117   : > { %vm4487_vm4 = vmor %vm4392_vm2, %vm5514_vm8  ;;  %vm417_vm2 = vcmp.eq.s32.totalorder %v4397_v28, %v4207_v61  ;;  %v4553_v40 = vpop.permute.xlu1 %490 }
 0x118   : > { %v5516_v5 = vsel %vm4487_vm4, 4294967295, %v5515_v5  ;;  %vm937_vm15 = vmor %vm761_vm0, %vm873_vm3  ;;  %vm5521_vm0 = vcmp.eq.s32.totalorder %v4397_v28, %v4218_v4  ;;  %v4795_v4 = vpop.permute.xlu0 %684 }
 0x119   : > { %vm4500_vm5 = vmor %vm5518_vm7, %vm5517_vm10  ;;  %vm882_vm10 = vcmp.eq.s32.totalorder %v4239_v12, %v4236_v11  ;;  %3415 = vmatpush3.bf16.msra.mxu0 %v3713_v54 }
 0x11a   : > { %vm941_vm8 = vmor %vm765_vm9, %vm877_vm12  ;;  %vm886_vm9 = vcmp.eq.s32.totalorder %v4239_v12, %v4256_v15  ;;  %3416 = vmatprep.subr.bf16.mxu0 %v3714_v56 }
 0x11b   : > { %vm4511_vm3 = vmor %vm421_vm11, %vm5521_vm0  ;;  %vm5528_vm0 = vnez %v5516_v5  ;;  %v4570_v41 = vpop.permute.xlu1 %493 }
 0x11c   : > { %vm3097_vm4 = vmpackc.low %vm941_vm8, %vm937_vm15 }
 0x11d   : > { %vm4517_vm7 = vmor %vm417_vm2, %vm529_vm1  ;;  %3098 = vmatmul.mubr.msk.bf16.vlgmr.msra.gmra.mrb[0].mxu1 %vm3097_vm4, %v3840_v20  ;;  %vm5526_vm1 = vnez %v5508_v32  ;;  %vm879_vm2 = vcmp.eq.s32.totalorder %v4224_v7, %v4236_v11  ;;  %vm5527_vm4 = vnez %v5512_v33  ;;  %3417 = vmatpush3.bf16.msra.mxu0 %v3714_v56 }
 0x11e   : > { %vm948_vm12 = vmor %vm4426_vm14, %vm884_vm6  ;;  %vm883_vm14 = vcmp.eq.s32.totalorder %v4224_v7, %v4256_v15 }
 0x11f   : > { %vm3067_vm11 = vmpackc.low %vm948_vm12, %vm4436_vm13  ;;  %vm705_vm13 = vcmp.eq.s32.totalorder %v4397_v28, %v4227_v8  ;;  %vm709_vm12 = vcmp.eq.s32.totalorder %v4397_v28, %v4190_v55  ;;  %v3717_v8 = vld [vmem:[#allocation3 + $0x28] sm:$0xff]  }
 0x120   : > { %3068 = vmatprep.mubr.msk.bf16.mxu0 %vm3067_vm11, %v3840_v20  ;;  %vm946_vm15 = vmor %vm5526_vm1, %vm882_vm10  ;;  %vm881_vm1 = vcmp.eq.s32.totalorder %v4397_v28, %v4236_v11  ;;  %v4581_v42 = vpop.permute.xlu1 %669  ;;  %v4814_v11 = vpop.permute.xlu0 %854 }
 0x121   : > { %vm950_vm8 = vmor %vm5527_vm4, %vm886_vm9 }
 0x122   : > { %vm3099_vm6 = vmpackc.low %vm950_vm8, %vm946_vm15  ;;  %vm536_vm8 = vcmp.eq.s32.totalorder %v4233_v10, %v4352_v25 }
 0x123   : > { %3100 = vmatprep.mubr.msk.bf16.mxu1 %vm3099_vm6, %v3840_v20  ;;  %vm943_vm10 = vmor %vm5528_vm0, %vm879_vm2  ;;  %vm885_vm2 = vcmp.eq.s32.totalorder %v4397_v28, %v4256_v15  ;;  %vm540_vm6 = vcmp.eq.s32.totalorder %v4233_v10, %v4216_v2  ;;  %vm428_vm0 = vcmp.eq.s32.totalorder %v4233_v10, %v4290_v19  ;;  %v3718_v15 = vld [vmem:[#allocation3 + $0x30] sm:$0xff]  }
 0x124   : > { %vm947_vm11 = vmor %vm4500_vm5, %vm883_vm14  ;;  %vm424_vm5 = vcmp.eq.s32.totalorder %v4233_v10, %v4549_v39 }
 0x125   : > { %vm3069_vm9 = vmpackc.low %vm947_vm11, %vm943_vm10  ;;  %vm716_vm10 = vcmp.eq.s32.totalorder %v4233_v10, %v4440_v31  ;;  %v4600_v44 = vpop.permute.xlu1 %842 }
 0x126   : > { %3070 = vmatmul.mubr.msk.bf16.gmra.mrb[4].mxu0 %vm3069_vm9, %v3840_v20  ;;  %vm769_vm15 = vmor %vm4517_vm7, %vm705_vm13  ;;  %vm712_vm13 = vcmp.eq.s32.totalorder %v4233_v10, %v4406_v29  ;;  %vm888_vm9 = vcmp.eq.s32.totalorder %v4233_v10, %v4198_v58 }
 0x127   : > { %vm773_vm4 = vmor %vm4511_vm3, %vm709_vm12 }
 0x128   : > { %vm945_vm14 = vmor %vm769_vm15, %vm881_vm1  ;;  %vm892_vm15 = vcmp.eq.s32.totalorder %v4233_v10, %v4504_v35 }
 0x129   : > { %vm949_vm7 = vmor %vm773_vm4, %vm885_vm2  ;;  %vm426_vm4 = vcmp.eq.s32.totalorder %v4239_v12, %v4549_v39 }
 0x12a   : > { %vm3101_vm3 = vmpackc.low %vm949_vm7, %vm945_vm14  ;;  %vm538_vm14 = vcmp.eq.s32.totalorder %v4239_v12, %v4352_v25  ;;  %v4616_v46 = vpop.permute.xlu1 %384 }
 0x12b   : > { %3102 = vmatmul.mubr.msk.bf16.gmra.mrb[4].mxu1 %vm3101_vm3, %v3840_v20  ;;  %vm600_vm12 = vmor %vm424_vm5, %vm536_vm8  ;;  %vm542_vm5 = vcmp.eq.s32.totalorder %v4239_v12, %v4216_v2  ;;  %vm430_vm8 = vcmp.eq.s32.totalorder %v4239_v12, %v4290_v19  ;;  %vm718_vm3 = vcmp.eq.s32.totalorder %v4239_v12, %v4440_v31 }
 0x12c   : > { %vm604_vm11 = vmor %vm428_vm0, %vm540_vm6  ;;  %vm714_vm0 = vcmp.eq.s32.totalorder %v4239_v12, %v4406_v29 }
 0x12d   : > { %vm776_vm1 = vmor %vm600_vm12, %vm712_vm13 }
 0x12e   : > { %vm780_vm2 = vmor %vm604_vm11, %vm716_vm10  ;;  %vm890_vm11 = vcmp.eq.s32.totalorder %v4239_v12, %v4198_v58  ;;  %v4635_v48 = vpop.permute.xlu1 %387 }
 0x12f   : > { %vm952_vm7 = vmor %vm776_vm1, %vm888_vm9  ;;  %vm894_vm1 = vcmp.eq.s32.totalorder %v4239_v12, %v4504_v35 }
 0x130   : > { %vm956_vm6 = vmor %vm780_vm2, %vm892_vm15  ;;  %vm423_vm2 = vcmp.eq.s32.totalorder %v4224_v7, %v4549_v39 }
 0x131   : > { %vm3071_vm13 = vmpackc.low %vm956_vm6, %vm952_vm7  ;;  %vm535_vm7 = vcmp.eq.s32.totalorder %v4224_v7, %v4352_v25 }
 0x132   : > { %3072 = vmatprep.mubr.msk.bf16.mxu0 %vm3071_vm13, %v3840_v20  ;;  %vm602_vm10 = vmor %vm426_vm4, %vm538_vm14  ;;  %vm539_vm4 = vcmp.eq.s32.totalorder %v4224_v7, %v4216_v2  ;;  %vm427_vm14 = vcmp.eq.s32.totalorder %v4224_v7, %v4290_v19  ;;  %vm715_vm13 = vcmp.eq.s32.totalorder %v4224_v7, %v4440_v31 }
 0x133   : > { %vm606_vm12 = vmor %vm430_vm8, %vm542_vm5  ;;  %vm711_vm8 = vcmp.eq.s32.totalorder %v4224_v7, %v4406_v29  ;;  %v4650_v50 = vpop.permute.xlu1 %499 }
 0x134   : > { %vm778_vm9 = vmor %vm602_vm10, %vm714_vm0 }
 0x135   : > { %vm782_vm15 = vmor %vm606_vm12, %vm718_vm3  ;;  %vm887_vm12 = vcmp.eq.s32.totalorder %v4224_v7, %v4198_v58 }
 0x136   : > { %vm954_vm6 = vmor %vm778_vm9, %vm890_vm11  ;;  %vm891_vm9 = vcmp.eq.s32.totalorder %v4224_v7, %v4504_v35 }
 0x137   : > { %vm958_vm5 = vmor %vm782_vm15, %vm894_vm1  ;;  %vm425_vm15 = vcmp.eq.s32.totalorder %v4397_v28, %v4549_v39 }
 0x138   : > { %vm3103_vm0 = vmpackc.low %vm958_vm5, %vm954_vm6  ;;  %vm537_vm6 = vcmp.eq.s32.totalorder %v4397_v28, %v4352_v25  ;;  %v4667_v51 = vpop.permute.xlu1 %672 }
 0x139   : > { %3104 = vmatprep.mubr.msk.bf16.mxu1 %vm3103_vm0, %v3840_v20  ;;  %vm599_vm3 = vmor %vm423_vm2, %vm535_vm7  ;;  %vm541_vm2 = vcmp.eq.s32.totalorder %v4397_v28, %v4216_v2  ;;  %vm429_vm7 = vcmp.eq.s32.totalorder %v4397_v28, %v4290_v19  ;;  %vm717_vm0 = vcmp.eq.s32.totalorder %v4397_v28, %v4440_v31  ;;  %v3716_v2 = vld [vmem:[#allocation3 + $0x20] sm:$0xff]   ;;  %v4896_v19 = vpop.permute.xlu0 %863 }
 0x13a   : > { %vm603_vm10 = vmor %vm427_vm14, %vm539_vm4  ;;  %vm713_vm14 = vcmp.eq.s32.totalorder %v4397_v28, %v4406_v29 }
 0x13b   : > { %vm775_vm11 = vmor %vm599_vm3, %vm711_vm8 }
 0x13c   : > { %vm779_vm1 = vmor %vm603_vm10, %vm715_vm13  ;;  %vm889_vm10 = vcmp.eq.s32.totalorder %v4397_v28, %v4198_v58  ;;  %v3715_v58 = vld [vmem:[#allocation3 + $0x18] sm:$0xff]  }
 0x13d   : > { %vm951_vm5 = vmor %vm775_vm11, %vm887_vm12  ;;  %vm893_vm11 = vcmp.eq.s32.totalorder %v4397_v28, %v4504_v35  ;;  %v4686_v52 = vpop.permute.xlu1 %848  ;;  %3418 = vmatprep.subr.bf16.mxu0 %v3715_v58  ;;  %v4959_v24 = vpop.permute.xlu0 %514 }
 0x13e   : > { %vm955_vm4 = vmor %vm779_vm1, %vm891_vm9  ;;  %3419 = vmatpush3.bf16.msra.mxu0 %v3715_v58 }
 0x13f   : > { %vm3073_vm8 = vmpackc.low %vm955_vm4, %vm951_vm5  ;;  %vm544_vm5 = vcmp.eq.s32.totalorder %v4233_v10, %v4553_v40  ;;  %vm432_vm4 = vcmp.eq.s32.totalorder %v4233_v10, %v4534_v38  ;;  %3420 = vmatprep.subr.bf16.mxu0 %v3716_v2 }
 0x140   : > { %3074 = vmatmul.mubr.msk.bf16.gmra.mrb[8].mxu0 %vm3073_vm8, %v3840_v20  ;;  %vm601_vm13 = vmor %vm425_vm15, %vm537_vm6  ;;  %vm436_vm15 = vcmp.eq.s32.totalorder %v4233_v10, %v4593_v43  ;;  %vm724_vm8 = vcmp.eq.s32.totalorder %v4233_v10, %v4581_v42 }
 0x141   : > { %vm605_vm3 = vmor %vm429_vm7, %vm541_vm2  ;;  %vm548_vm2 = vcmp.eq.s32.totalorder %v4233_v10, %v4570_v41  ;;  %v4703_v55 = vpop.permute.xlu1 %851  ;;  %v694_v26 = vpop.permute.xlu0 %693 }
 0x142   : > { %vm777_vm12 = vmor %vm601_vm13, %vm713_vm14  ;;  %vm720_vm14 = vcmp.eq.s32.totalorder %v4233_v10, %v4646_v49  ;;  %3421 = vmatpush3.bf16.msra.mxu0 %v3716_v2 }
 0x143   : > { %vm781_vm9 = vmor %vm605_vm3, %vm717_vm0  ;;  %vm896_vm3 = vcmp.eq.s32.totalorder %v4233_v10, %v4600_v44  ;;  %3422 = vmatprep.subr.bf16.mxu0 %v3717_v8 }
 0x144   : > { %vm953_vm1 = vmor %vm777_vm12, %vm889_vm10  ;;  %vm900_vm12 = vcmp.eq.s32.totalorder %v4233_v10, %v4204_v60 }
 0x145   : > { %vm957_vm6 = vmor %vm781_vm9, %vm893_vm11  ;;  %vm546_vm9 = vcmp.eq.s32.totalorder %v4239_v12, %v4553_v40 }
 0x146   : > { %vm3105_vm7 = vmpackc.low %vm957_vm6, %vm953_vm1  ;;  %vm438_vm6 = vcmp.eq.s32.totalorder %v4239_v12, %v4593_v43  ;;  %v4720_v57 = vpop.permute.xlu1 %393  ;;  %3423 = vmatpush3.bf16.msra.mxu0 %v3717_v8 }
 0x147   : > { %3106 = vmatmul.mubr.msk.bf16.gmra.mrb[8].mxu1 %vm3105_vm7, %v3840_v20  ;;  %vm608_vm0 = vmor %vm432_vm4, %vm544_vm5  ;;  %vm550_vm5 = vcmp.eq.s32.totalorder %v4239_v12, %v4570_v41  ;;  %vm722_vm7 = vcmp.eq.s32.totalorder %v4239_v12, %v4646_v49  ;;  %3424 = vmatprep.subr.bf16.mxu0 %v3718_v15 }
 0x148   : > { %vm612_vm13 = vmor %vm436_vm15, %vm548_vm2  ;;  %vm434_vm2 = vcmp.eq.s32.totalorder %v4239_v12, %v4534_v38 }
 0x149   : > { %vm784_vm10 = vmor %vm608_vm0, %vm720_vm14  ;;  %vm726_vm14 = vcmp.eq.s32.totalorder %v4239_v12, %v4581_v42 }
 0x14a   : > { %vm788_vm11 = vmor %vm612_vm13, %vm724_vm8  ;;  %vm898_vm13 = vcmp.eq.s32.totalorder %v4239_v12, %v4600_v44  ;;  %3425 = vmatpush3.bf16.msra.mxu0 %v3718_v15  ;;  %v3721_v15 = vld [vmem:[#allocation3 + $0x48] sm:$0xff]  }
 0x14b   : > { %vm960_vm1 = vmor %vm784_vm10, %vm896_vm3  ;;  %vm902_vm10 = vcmp.eq.s32.totalorder %v4239_v12, %v4204_v60  ;;  %3426 = vmatprep.subr.bf16.mxu0 %v3719_v16 }
 0x14c   : > { %vm964_vm15 = vmor %vm788_vm11, %vm900_vm12  ;;  %vm543_vm11 = vcmp.eq.s32.totalorder %v4224_v7, %v4553_v40 }
 0x14d   : > { %vm3075_vm4 = vmpackc.low %vm964_vm15, %vm960_vm1  ;;  %vm435_vm15 = vcmp.eq.s32.totalorder %v4224_v7, %v4593_v43 }
 0x14e   : > { %3076 = vmatprep.mubr.msk.bf16.mxu0 %vm3075_vm4, %v3840_v20  ;;  %vm610_vm8 = vmor %vm434_vm2, %vm546_vm9  ;;  %vm547_vm9 = vcmp.eq.s32.totalorder %v4224_v7, %v4570_v41  ;;  %vm719_vm2 = vcmp.eq.s32.totalorder %v4224_v7, %v4646_v49  ;;  %vm723_vm4 = vcmp.eq.s32.totalorder %v4224_v7, %v4581_v42  ;;  %3427 = vmatpush3.bf16.msra.mxu0 %v3719_v16 }
 0x14f   : > { %vm614_vm0 = vmor %vm438_vm6, %vm550_vm5  ;;  %vm431_vm5 = vcmp.eq.s32.totalorder %v4224_v7, %v4534_v38 }
 0x150   : > { %vm786_vm3 = vmor %vm610_vm8, %vm722_vm7 }
 0x151   : > { %vm790_vm12 = vmor %vm614_vm0, %vm726_vm14  ;;  %vm895_vm0 = vcmp.eq.s32.totalorder %v4224_v7, %v4600_v44 }
 0x152   : > { %vm962_vm1 = vmor %vm786_vm3, %vm898_vm13  ;;  %vm899_vm3 = vcmp.eq.s32.totalorder %v4224_v7, %v4204_v60 }
 0x153   : > { %vm966_vm6 = vmor %vm790_vm12, %vm902_vm10  ;;  %vm545_vm12 = vcmp.eq.s32.totalorder %v4397_v28, %v4553_v40 }
 0x154   : > { %vm3107_vm7 = vmpackc.low %vm966_vm6, %vm962_vm1  ;;  %vm433_vm6 = vcmp.eq.s32.totalorder %v4397_v28, %v4534_v38 }
 0x155   : > { %3108 = vmatprep.mubr.msk.bf16.mxu1 %vm3107_vm7, %v3840_v20  ;;  %vm607_vm14 = vmor %vm431_vm5, %vm543_vm11  ;;  %vm437_vm11 = vcmp.eq.s32.totalorder %v4397_v28, %v4593_v43  ;;  %vm721_vm5 = vcmp.eq.s32.totalorder %v4397_v28, %v4646_v49  ;;  %vm725_vm7 = vcmp.eq.s32.totalorder %v4397_v28, %v4581_v42 }
 0x156   : > { %vm611_vm8 = vmor %vm435_vm15, %vm547_vm9  ;;  %vm549_vm15 = vcmp.eq.s32.totalorder %v4397_v28, %v4570_v41 }
 0x157   : > { %vm783_vm13 = vmor %vm607_vm14, %vm719_vm2 }
 0x158   : > { %vm787_vm10 = vmor %vm611_vm8, %vm723_vm4  ;;  %vm897_vm8 = vcmp.eq.s32.totalorder %v4397_v28, %v4600_v44 }
 0x159   : > { %vm959_vm1 = vmor %vm783_vm13, %vm895_vm0  ;;  %vm901_vm13 = vcmp.eq.s32.totalorder %v4397_v28, %v4204_v60  ;;  %v4736_v60 = vpop.permute.xlu1 %502 }
 0x15a   : > { %vm963_vm9 = vmor %vm787_vm10, %vm899_vm3  ;;  %vm552_vm10 = vcmp.eq.s32.totalorder %v4233_v10, %v4221_v6 }
 0x15b   : > { %vm3077_vm2 = vmpackc.low %vm963_vm9, %vm959_vm1 }
 0x15c   : > { %3078 = vmatmul.mubr.msk.bf16.gmra.mrb[12].mxu0 %vm3077_vm2, %v3840_v20  ;;  %vm609_vm4 = vmor %vm433_vm6, %vm545_vm12  ;;  %vm440_vm12 = vcmp.eq.s32.totalorder %v4233_v10, %v4616_v46  ;;  %vm728_vm6 = vcmp.eq.s32.totalorder %v4233_v10, %v4667_v51  ;;  %vm732_vm2 = vcmp.eq.s32.totalorder %v4233_v10, %v4730_v59 }
 0x15d   : > { %vm613_vm14 = vmor %vm437_vm11, %vm549_vm15  ;;  %vm556_vm15 = vcmp.eq.s32.totalorder %v4233_v10, %v4650_v50  ;;  %v4753_v61 = vpop.permute.xlu1 %678 }
 0x15e   : > { %vm785_vm0 = vmor %vm609_vm4, %vm721_vm5  ;;  %vm444_vm5 = vcmp.eq.s32.totalorder %v4233_v10, %v4635_v48 }
 0x15f   : > { %vm789_vm3 = vmor %vm613_vm14, %vm725_vm7  ;;  %vm904_vm14 = vcmp.eq.s32.totalorder %v4233_v10, %v4686_v52 }
 0x160   : > { %vm961_vm1 = vmor %vm785_vm0, %vm897_vm8  ;;  %vm908_vm0 = vcmp.eq.s32.totalorder %v4233_v10, %v4703_v55 }
 0x161   : > { %vm965_vm11 = vmor %vm789_vm3, %vm901_vm13  ;;  %vm554_vm3 = vcmp.eq.s32.totalorder %v4239_v12, %v4221_v6  ;;  %v4770_v62 = vpop.permute.xlu1 %681 }
 0x162   : > { %vm3109_vm9 = vmpackc.low %vm965_vm11, %vm961_vm1  ;;  %vm442_vm1 = vcmp.eq.s32.totalorder %v4239_v12, %v4616_v46 }
 0x163   : > { %3110 = vmatmul.mubr.msk.bf16.gmra.mrb[12].mxu1 %vm3109_vm9, %v3840_v20  ;;  %vm616_vm7 = vmor %vm440_vm12, %vm552_vm10  ;;  %vm558_vm10 = vcmp.eq.s32.totalorder %v4239_v12, %v4650_v50 }
 0x164   : > { %vm620_vm4 = vmor %vm444_vm5, %vm556_vm15  ;;  %vm730_vm15 = vcmp.eq.s32.totalorder %v4239_v12, %v4667_v51  ;;  %vm734_vm5 = vcmp.eq.s32.totalorder %v4239_v12, %v4730_v59 }
 0x165   : > { %vm792_vm8 = vmor %vm616_vm7, %vm728_vm6  ;;  %vm446_vm6 = vcmp.eq.s32.totalorder %v4239_v12, %v4635_v48  ;;  %v4785_v63 = vpop.permute.xlu1 %857 }
 0x166   : > { %vm796_vm13 = vmor %vm620_vm4, %vm732_vm2  ;;  %vm906_vm4 = vcmp.eq.s32.totalorder %v4239_v12, %v4686_v52 }
 0x167   : > { %vm968_vm11 = vmor %vm792_vm8, %vm904_vm14  ;;  %vm910_vm8 = vcmp.eq.s32.totalorder %v4239_v12, %v4703_v55 }
 0x168   : > { %vm972_vm12 = vmor %vm796_vm13, %vm908_vm0  ;;  %vm551_vm13 = vcmp.eq.s32.totalorder %v4224_v7, %v4221_v6 }
 0x169   : > { %vm3079_vm9 = vmpackc.low %vm972_vm12, %vm968_vm11  ;;  %vm439_vm11 = vcmp.eq.s32.totalorder %v4224_v7, %v4616_v46 }
 0x16a   : > { %3080 = vmatprep.mubr.msk.bf16.mxu0 %vm3079_vm9, %v3840_v20  ;;  %vm618_vm2 = vmor %vm442_vm1, %vm554_vm3  ;;  %vm555_vm3 = vcmp.eq.s32.totalorder %v4224_v7, %v4650_v50  ;;  %vm443_vm9 = vcmp.eq.s32.totalorder %v4224_v7, %v4635_v48 }
 0x16b   : > { %vm622_vm7 = vmor %vm446_vm6, %vm558_vm10  ;;  %vm727_vm10 = vcmp.eq.s32.totalorder %v4224_v7, %v4667_v51  ;;  %vm731_vm6 = vcmp.eq.s32.totalorder %v4224_v7, %v4730_v59 }
 0x16c   : > { %vm794_vm14 = vmor %vm618_vm2, %vm730_vm15 }
 0x16d   : > { %vm798_vm0 = vmor %vm622_vm7, %vm734_vm5  ;;  %vm903_vm7 = vcmp.eq.s32.totalorder %v4224_v7, %v4686_v52 }
 0x16e   : > { %vm970_vm12 = vmor %vm794_vm14, %vm906_vm4  ;;  %vm907_vm14 = vcmp.eq.s32.totalorder %v4224_v7, %v4703_v55 }
 0x16f   : > { %vm974_vm1 = vmor %vm798_vm0, %vm910_vm8  ;;  %vm553_vm0 = vcmp.eq.s32.totalorder %v4397_v28, %v4221_v6  ;;  %v4806_v6 = vpop.permute.xlu1 %396 }
 0x170   : > { %vm3111_vm15 = vmpackc.low %vm974_vm1, %vm970_vm12  ;;  %vm441_vm12 = vcmp.eq.s32.totalorder %v4397_v28, %v4616_v46 }
 0x171   : > { %3112 = vmatprep.mubr.msk.bf16.mxu1 %vm3111_vm15, %v3840_v20  ;;  %vm615_vm5 = vmor %vm439_vm11, %vm551_vm13  ;;  %vm557_vm13 = vcmp.eq.s32.totalorder %v4397_v28, %v4650_v50  ;;  %vm445_vm15 = vcmp.eq.s32.totalorder %v4397_v28, %v4635_v48 }
 0x172   : > { %vm619_vm2 = vmor %vm443_vm9, %vm555_vm3  ;;  %vm729_vm3 = vcmp.eq.s32.totalorder %v4397_v28, %v4667_v51  ;;  %vm733_vm9 = vcmp.eq.s32.totalorder %v4397_v28, %v4730_v59 }
 0x173   : > { %vm791_vm4 = vmor %vm615_vm5, %vm727_vm10  ;;  %v4825_v14 = vpop.permute.xlu1 %508 }
 0x174   : > { %vm795_vm8 = vmor %vm619_vm2, %vm731_vm6  ;;  %vm905_vm2 = vcmp.eq.s32.totalorder %v4397_v28, %v4686_v52 }
 0x175   : > { %vm967_vm1 = vmor %vm791_vm4, %vm903_vm7  ;;  %vm909_vm4 = vcmp.eq.s32.totalorder %v4397_v28, %v4703_v55 }
 0x176   : > { %vm971_vm11 = vmor %vm795_vm8, %vm907_vm14  ;;  %vm448_vm8 = vcmp.eq.s32.totalorder %v4233_v10, %v4612_v45 }
 0x177   : > { %vm3081_vm10 = vmpackc.low %vm971_vm11, %vm967_vm1  ;;  %v4842_v17 = vpop.permute.xlu1 %511 }
 0x178   : > { %3082 = vmatmul.mubr.msk.bf16.gmra.mrb[16].mxu0 %vm3081_vm10, %v3840_v20  ;;  %vm617_vm6 = vmor %vm441_vm12, %vm553_vm0  ;;  %vm560_vm0 = vcmp.eq.s32.totalorder %v4233_v10, %v4736_v60  ;;  %vm564_vm10 = vcmp.eq.s32.totalorder %v4233_v10, %v4230_v9 }
 0x179   : > { %vm621_vm5 = vmor %vm445_vm15, %vm557_vm13  ;;  %vm452_vm13 = vcmp.eq.s32.totalorder %v4233_v10, %v4720_v57  ;;  %vm740_vm15 = vcmp.eq.s32.totalorder %v4233_v10, %v4770_v62 }
 0x17a   : > { %vm793_vm7 = vmor %vm617_vm6, %vm729_vm3  ;;  %vm736_vm3 = vcmp.eq.s32.totalorder %v4233_v10, %v4753_v61 }
 0x17b   : > { %vm797_vm14 = vmor %vm621_vm5, %vm733_vm9  ;;  %vm912_vm5 = vcmp.eq.s32.totalorder %v4233_v10, %v4814_v11  ;;  %v4856_v18 = vpop.permute.xlu1 %687 }
 0x17c   : > { %vm969_vm1 = vmor %vm793_vm7, %vm905_vm2  ;;  %vm916_vm7 = vcmp.eq.s32.totalorder %v4233_v10, %v4785_v63 }
 0x17d   : > { %vm973_vm12 = vmor %vm797_vm14, %vm909_vm4  ;;  %vm450_vm14 = vcmp.eq.s32.totalorder %v4239_v12, %v4612_v45 }
 0x17e   : > { %vm3113_vm11 = vmpackc.low %vm973_vm12, %vm969_vm1  ;;  %vm562_vm1 = vcmp.eq.s32.totalorder %v4239_v12, %v4736_v60 }
 0x17f   : > { %3114 = vmatmul.mubr.msk.bf16.gmra.mrb[16].mxu1 %vm3113_vm11, %v3840_v20  ;;  %vm624_vm9 = vmor %vm448_vm8, %vm560_vm0  ;;  %vm454_vm8 = vcmp.eq.s32.totalorder %v4239_v12, %v4720_v57  ;;  %v4873_v13 = vpop.permute.xlu1 %860 }
 0x180   : > { %vm628_vm6 = vmor %vm452_vm13, %vm564_vm10  ;;  %vm738_vm13 = vcmp.eq.s32.totalorder %v4239_v12, %v4753_v61  ;;  %vm742_vm10 = vcmp.eq.s32.totalorder %v4239_v12, %v4770_v62 }
 0x181   : > { %vm800_vm2 = vmor %vm624_vm9, %vm736_vm3  ;;  %vm566_vm3 = vcmp.eq.s32.totalorder %v4239_v12, %v4230_v9 }
 0x182   : > { %vm804_vm4 = vmor %vm628_vm6, %vm740_vm15  ;;  %vm914_vm6 = vcmp.eq.s32.totalorder %v4239_v12, %v4814_v11 }
 0x183   : > { %vm976_vm12 = vmor %vm800_vm2, %vm912_vm5  ;;  %vm918_vm2 = vcmp.eq.s32.totalorder %v4239_v12, %v4785_v63 }
 0x184   : > { %vm980_vm0 = vmor %vm804_vm4, %vm916_vm7  ;;  %vm447_vm4 = vcmp.eq.s32.totalorder %v4224_v7, %v4612_v45 }
 0x185   : > { %vm3083_vm11 = vmpackc.low %vm980_vm0, %vm976_vm12  ;;  %vm559_vm12 = vcmp.eq.s32.totalorder %v4224_v7, %v4736_v60  ;;  %vm735_vm0 = vcmp.eq.s32.totalorder %v4224_v7, %v4753_v61 }
 0x186   : > { %3084 = vmatprep.mubr.msk.bf16.mxu0 %vm3083_vm11, %v3840_v20  ;;  %vm626_vm15 = vmor %vm450_vm14, %vm562_vm1  ;;  %vm451_vm1 = vcmp.eq.s32.totalorder %v4224_v7, %v4720_v57  ;;  %vm563_vm11 = vcmp.eq.s32.totalorder %v4224_v7, %v4230_v9 }
 0x187   : > { %vm630_vm9 = vmor %vm454_vm8, %vm566_vm3  ;;  %vm739_vm3 = vcmp.eq.s32.totalorder %v4224_v7, %v4770_v62 }
 0x188   : > { %vm802_vm5 = vmor %vm626_vm15, %vm738_vm13 }
 0x189   : > { %vm806_vm7 = vmor %vm630_vm9, %vm742_vm10  ;;  %vm911_vm9 = vcmp.eq.s32.totalorder %v4224_v7, %v4814_v11 }
 0x18a   : > { %vm978_vm14 = vmor %vm802_vm5, %vm914_vm6  ;;  %vm915_vm5 = vcmp.eq.s32.totalorder %v4224_v7, %v4785_v63 }
 0x18b   : > { %vm982_vm8 = vmor %vm806_vm7, %vm918_vm2  ;;  %vm449_vm7 = vcmp.eq.s32.totalorder %v4397_v28, %v4612_v45 }
 0x18c   : > { %vm3115_vm13 = vmpackc.low %vm982_vm8, %vm978_vm14  ;;  %vm561_vm14 = vcmp.eq.s32.totalorder %v4397_v28, %v4736_v60 }
 0x18d   : > { %3116 = vmatprep.mubr.msk.bf16.mxu1 %vm3115_vm13, %v3840_v20  ;;  %vm623_vm10 = vmor %vm447_vm4, %vm559_vm12  ;;  %vm453_vm13 = vcmp.eq.s32.totalorder %v4397_v28, %v4720_v57  ;;  %vm737_vm12 = vcmp.eq.s32.totalorder %v4397_v28, %v4753_v61 }
 0x18e   : > { %vm627_vm15 = vmor %vm451_vm1, %vm563_vm11  ;;  %vm741_vm11 = vcmp.eq.s32.totalorder %v4397_v28, %v4770_v62 }
 0x18f   : > { %vm799_vm6 = vmor %vm623_vm10, %vm735_vm0  ;;  %vm565_vm0 = vcmp.eq.s32.totalorder %v4397_v28, %v4230_v9  ;;  %v4888_v9 = vpop.permute.xlu1 %402 }
 0x190   : > { %vm803_vm2 = vmor %vm627_vm15, %vm739_vm3  ;;  %vm913_vm15 = vcmp.eq.s32.totalorder %v4397_v28, %v4814_v11 }
 0x191   : > { %vm975_vm8 = vmor %vm799_vm6, %vm911_vm9  ;;  %vm917_vm6 = vcmp.eq.s32.totalorder %v4397_v28, %v4785_v63 }
 0x192   : > { %vm979_vm4 = vmor %vm803_vm2, %vm915_vm5 }
 0x193   : > { %vm3085_vm1 = vmpackc.low %vm979_vm4, %vm975_vm8  ;;  %vm568_vm8 = vcmp.eq.s32.totalorder %v4233_v10, %v4825_v14  ;;  %v4907_v21 = vpop.permute.xlu1 %405 }
 0x194   : > { %3086 = vmatmul.mubr.msk.bf16.gmra.mrb[20].mxu0 %vm3085_vm1, %v3840_v20  ;;  %vm625_vm3 = vmor %vm449_vm7, %vm561_vm14  ;;  %vm572_vm1 = vcmp.eq.s32.totalorder %v4233_v10, %v4842_v17  ;;  %vm744_vm7 = vcmp.eq.s32.totalorder %v4233_v10, %v4795_v4 }
 0x195   : > { %vm629_vm10 = vmor %vm453_vm13, %vm565_vm0  ;;  %vm456_vm13 = vcmp.eq.s32.totalorder %v4233_v10, %v4806_v6  ;;  %vm748_vm0 = vcmp.eq.s32.totalorder %v4233_v10, %v4856_v18 }
 0x196   : > { %vm801_vm9 = vmor %vm625_vm3, %vm737_vm12  ;;  %vm460_vm12 = vcmp.eq.s32.totalorder %v4233_v10, %v4629_v47 }
 0x197   : > { %vm805_vm5 = vmor %vm629_vm10, %vm741_vm11  ;;  %vm920_vm10 = vcmp.eq.s32.totalorder %v4233_v10, %v4873_v13  ;;  %v4926_v22 = vpop.permute.xlu1 %517 }
 0x198   : > { %vm977_vm2 = vmor %vm801_vm9, %vm913_vm15  ;;  %vm924_vm9 = vcmp.eq.s32.totalorder %v4233_v10, %v4896_v19 }
 0x199   : > { %vm981_vm4 = vmor %vm805_vm5, %vm917_vm6  ;;  %vm570_vm5 = vcmp.eq.s32.totalorder %v4239_v12, %v4825_v14 }
 0x19a   : > { %vm3117_vm14 = vmpackc.low %vm981_vm4, %vm977_vm2  ;;  %vm574_vm4 = vcmp.eq.s32.totalorder %v4239_v12, %v4842_v17 }
 0x19b   : > { %3118 = vmatmul.mubr.msk.bf16.gmra.mrb[20].mxu1 %vm3117_vm14, %v3840_v20  ;;  %vm632_vm11 = vmor %vm456_vm13, %vm568_vm8  ;;  %vm746_vm8 = vcmp.eq.s32.totalorder %v4239_v12, %v4795_v4  ;;  %vm462_vm13 = vcmp.eq.s32.totalorder %v4239_v12, %v4629_v47  ;;  %v4943_v23 = vpop.permute.xlu1 %690 }
 0x19c   : > { %vm636_vm3 = vmor %vm460_vm12, %vm572_vm1  ;;  %vm458_vm1 = vcmp.eq.s32.totalorder %v4239_v12, %v4806_v6  ;;  %vm750_vm12 = vcmp.eq.s32.totalorder %v4239_v12, %v4856_v18 }
 0x19d   : > { %vm808_vm15 = vmor %vm632_vm11, %vm744_vm7 }
 0x19e   : > { %vm812_vm6 = vmor %vm636_vm3, %vm748_vm0  ;;  %vm922_vm3 = vcmp.eq.s32.totalorder %v4239_v12, %v4873_v13 }
 0x19f   : > { %vm984_vm2 = vmor %vm808_vm15, %vm920_vm10  ;;  %vm926_vm15 = vcmp.eq.s32.totalorder %v4239_v12, %v4896_v19  ;;  %v4962_v25 = vpop.permute.xlu1 %866 }
 0x1a0   : > { %vm988_vm14 = vmor %vm812_vm6, %vm924_vm9  ;;  %vm567_vm6 = vcmp.eq.s32.totalorder %v4224_v7, %v4825_v14 }
 0x1a1   : > { %vm3087_vm7 = vmpackc.low %vm988_vm14, %vm984_vm2  ;;  %vm571_vm14 = vcmp.eq.s32.totalorder %v4224_v7, %v4842_v17 }
 0x1a2   : > { %3088 = vmatprep.mubr.msk.bf16.mxu0 %vm3087_vm7, %v3840_v20  ;;  %vm634_vm0 = vmor %vm458_vm1, %vm570_vm5  ;;  %vm743_vm5 = vcmp.eq.s32.totalorder %v4224_v7, %v4795_v4  ;;  %vm459_vm1 = vcmp.eq.s32.totalorder %v4224_v7, %v4629_v47 }
 0x1a3   : > { %vm638_vm11 = vmor %vm462_vm13, %vm574_vm4  ;;  %vm455_vm4 = vcmp.eq.s32.totalorder %v4224_v7, %v4806_v6  ;;  %vm747_vm13 = vcmp.eq.s32.totalorder %v4224_v7, %v4856_v18  ;;  %v870_v1 = vpop.permute.xlu1 %869 }
 0x1a4   : > { %vm810_vm10 = vmor %vm634_vm0, %vm746_vm8 }
 0x1a5   : > { %vm814_vm9 = vmor %vm638_vm11, %vm750_vm12  ;;  %vm919_vm11 = vcmp.eq.s32.totalorder %v4224_v7, %v4873_v13 }
 0x1a6   : > { %vm986_vm2 = vmor %vm810_vm10, %vm922_vm3  ;;  %vm923_vm10 = vcmp.eq.s32.totalorder %v4224_v7, %v4896_v19 }
 0x1a7   : > { %vm990_vm7 = vmor %vm814_vm9, %vm926_vm15  ;;  %vm569_vm9 = vcmp.eq.s32.totalorder %v4397_v28, %v4825_v14  ;;  %v3720_v14 = vld [vmem:[#allocation3 + $0x40] sm:$0xff]  }
 0x1a8   : > { %vm3119_vm8 = vmpackc.low %vm990_vm7, %vm986_vm2  ;;  %vm573_vm7 = vcmp.eq.s32.totalorder %v4397_v28, %v4842_v17  ;;  %3444 = vmatprep.subr.bf16.mxu1 %v3720_v14 }
 0x1a9   : > { %3120 = vmatprep.mubr.msk.bf16.mxu1 %vm3119_vm8, %v3840_v20  ;;  %vm631_vm12 = vmor %vm455_vm4, %vm567_vm6  ;;  %vm745_vm6 = vcmp.eq.s32.totalorder %v4397_v28, %v4795_v4  ;;  %3445 = vmatpush3.bf16.msra.mxu1 %v3720_v14 }
 0x1aa   : > { %vm635_vm0 = vmor %vm459_vm1, %vm571_vm14  ;;  %vm457_vm14 = vcmp.eq.s32.totalorder %v4397_v28, %v4806_v6  ;;  %vm749_vm1 = vcmp.eq.s32.totalorder %v4397_v28, %v4856_v18  ;;  %3446 = vmatprep.subr.bf16.mxu1 %v3721_v15 }
 0x1ab   : > { %vm807_vm3 = vmor %vm631_vm12, %vm743_vm5  ;;  %vm461_vm5 = vcmp.eq.s32.totalorder %v4397_v28, %v4629_v47 }
 0x1ac   : > { %vm811_vm15 = vmor %vm635_vm0, %vm747_vm13  ;;  %vm921_vm0 = vcmp.eq.s32.totalorder %v4397_v28, %v4873_v13 }
 0x1ad   : > { %vm983_vm2 = vmor %vm807_vm3, %vm919_vm11  ;;  %vm925_vm3 = vcmp.eq.s32.totalorder %v4397_v28, %v4896_v19  ;;  %3447 = vmatpush3.bf16.msra.mxu1 %v3721_v15 }
 0x1ae   : > { %vm987_vm8 = vmor %vm811_vm15, %vm923_vm10  ;;  %vm576_vm15 = vcmp.eq.s32.totalorder %v4233_v10, %v4959_v24 }
 0x1af   : > { %vm3089_vm4 = vmpackc.low %vm987_vm8, %vm983_vm2  ;;  %vm464_vm8 = vcmp.eq.s32.totalorder %v4233_v10, %v4888_v9 }
 0x1b0   : > { %3090 = vmatmul.mubr.msk.bf16.gmra.mrb[24].mxu0 %vm3089_vm4, %v3840_v20  ;;  %vm633_vm13 = vmor %vm457_vm14, %vm569_vm9  ;;  %vm468_vm4 = vcmp.eq.s32.totalorder %v4233_v10, %v4907_v21 }
 0x1b1   : > { %vm637_vm12 = vmor %vm461_vm5, %vm573_vm7  ;;  %vm580_vm7 = vcmp.eq.s32.totalorder %v4233_v10, %v4926_v22  ;;  %vm756_vm5 = vcmp.eq.s32.totalorder %v4233_v10, %v694_v26 }
 0x1b2   : > { %vm809_vm11 = vmor %vm633_vm13, %vm745_vm6  ;;  %vm752_vm6 = vcmp.eq.s32.totalorder %v4233_v10, %v4943_v23 }
 0x1b3   : > { %vm813_vm10 = vmor %vm637_vm12, %vm749_vm1  ;;  %vm928_vm12 = vcmp.eq.s32.totalorder %v4233_v10, %v4962_v25 }
 0x1b4   : > { %vm985_vm2 = vmor %vm809_vm11, %vm921_vm0  ;;  %vm932_vm11 = vcmp.eq.s32.totalorder %v4233_v10, %v870_v1 }
 0x1b5   : > { %vm989_vm9 = vmor %vm813_vm10, %vm925_vm3  ;;  %vm578_vm10 = vcmp.eq.s32.totalorder %v4239_v12, %v4959_v24 }
 0x1b6   : > { %vm3121_vm14 = vmpackc.low %vm989_vm9, %vm985_vm2  ;;  %vm466_vm2 = vcmp.eq.s32.totalorder %v4239_v12, %v4888_v9 }
 0x1b7   : > { %3122 = vmatmul.mubr.msk.bf16.gmra.mrb[24].mxu1 %vm3121_vm14, %v3840_v20  ;;  %vm640_vm1 = vmor %vm464_vm8, %vm576_vm15  ;;  %vm582_vm14 = vcmp.eq.s32.totalorder %v4239_v12, %v4926_v22  ;;  %vm754_vm15 = vcmp.eq.s32.totalorder %v4239_v12, %v4943_v23 }
 0x1b8   : > { %vm644_vm13 = vmor %vm468_vm4, %vm580_vm7  ;;  %vm758_vm4 = vcmp.eq.s32.totalorder %v4239_v12, %v694_v26 }
 0x1b9   : > { %vm816_vm0 = vmor %vm640_vm1, %vm752_vm6  ;;  %vm470_vm6 = vcmp.eq.s32.totalorder %v4239_v12, %v4907_v21 }
 0x1ba   : > { %vm820_vm3 = vmor %vm644_vm13, %vm756_vm5  ;;  %vm930_vm13 = vcmp.eq.s32.totalorder %v4239_v12, %v4962_v25 }
 0x1bb   : > { %vm992_vm9 = vmor %vm816_vm0, %vm928_vm12  ;;  %vm934_vm0 = vcmp.eq.s32.totalorder %v4239_v12, %v870_v1 }
 0x1bc   : > { %vm996_vm8 = vmor %vm820_vm3, %vm932_vm11  ;;  %vm575_vm3 = vcmp.eq.s32.totalorder %v4224_v7, %v4959_v24 }
 0x1bd   : > { %vm3091_vm7 = vmpackc.low %vm996_vm8, %vm992_vm9  ;;  %vm463_vm9 = vcmp.eq.s32.totalorder %v4224_v7, %v4888_v9 }
 0x1be   : > { %3092 = vmatprep.mubr.msk.bf16.mxu0 %vm3091_vm7, %v3840_v20  ;;  %vm642_vm5 = vmor %vm466_vm2, %vm578_vm10  ;;  %vm579_vm7 = vcmp.eq.s32.totalorder %v4224_v7, %v4926_v22  ;;  %vm751_vm10 = vcmp.eq.s32.totalorder %v4224_v7, %v4943_v23 }
 0x1bf   : > { %vm646_vm1 = vmor %vm470_vm6, %vm582_vm14  ;;  %vm755_vm6 = vcmp.eq.s32.totalorder %v4224_v7, %v694_v26 }
 0x1c0   : > { %vm818_vm12 = vmor %vm642_vm5, %vm754_vm15  ;;  %vm467_vm15 = vcmp.eq.s32.totalorder %v4224_v7, %v4907_v21 }
 0x1c1   : > { %vm822_vm11 = vmor %vm646_vm1, %vm758_vm4  ;;  %vm927_vm1 = vcmp.eq.s32.totalorder %v4224_v7, %v4962_v25 }
 0x1c2   : > { %vm994_vm8 = vmor %vm818_vm12, %vm930_vm13  ;;  %vm931_vm12 = vcmp.eq.s32.totalorder %v4224_v7, %v870_v1 }
 0x1c3   : > { %vm998_vm2 = vmor %vm822_vm11, %vm934_vm0  ;;  %vm577_vm11 = vcmp.eq.s32.totalorder %v4397_v28, %v4959_v24  ;;  %v3723_v24 = vld [vmem:[#allocation3 + $0x58] sm:$0xff]  }
 0x1c4   : > { %vm3123_vm14 = vmpackc.low %vm998_vm2, %vm994_vm8  ;;  %vm465_vm8 = vcmp.eq.s32.totalorder %v4397_v28, %v4888_v9  ;;  %v3722_v9 = vld [vmem:[#allocation3 + $0x50] sm:$0xff]  }
 0x1c5   : > { %3124 = vmatprep.mubr.msk.bf16.mxu1 %vm3123_vm14, %v3840_v20  ;;  %vm639_vm4 = vmor %vm463_vm9, %vm575_vm3  ;;  %vm581_vm14 = vcmp.eq.s32.totalorder %v4397_v28, %v4926_v22  ;;  %vm753_vm9 = vcmp.eq.s32.totalorder %v4397_v28, %v4943_v23  ;;  %3448 = vmatprep.subr.bf16.mxu1 %v3722_v9 }
 0x1c6   : > { %vm643_vm5 = vmor %vm467_vm15, %vm579_vm7  ;;  %vm757_vm15 = vcmp.eq.s32.totalorder %v4397_v28, %v694_v26  ;;  %3449 = vmatpush3.bf16.msra.mxu1 %v3722_v9 }
 0x1c7   : > { %vm815_vm13 = vmor %vm639_vm4, %vm751_vm10  ;;  %vm469_vm10 = vcmp.eq.s32.totalorder %v4397_v28, %v4907_v21  ;;  %3450 = vmatprep.subr.bf16.mxu1 %v3723_v24 }
 0x1c8   : > { %vm819_vm0 = vmor %vm643_vm5, %vm755_vm6  ;;  %vm929_vm5 = vcmp.eq.s32.totalorder %v4397_v28, %v4962_v25 }
 0x1c9   : > { %vm991_vm2 = vmor %vm815_vm13, %vm927_vm1  ;;  %vm933_vm13 = vcmp.eq.s32.totalorder %v4397_v28, %v870_v1 }
 0x1ca   : > { %vm995_vm3 = vmor %vm819_vm0, %vm931_vm12  ;;  %3451 = vmatpush3.bf16.msra.mxu1 %v3723_v24 }
 0x1cb   : > { %vm3093_vm7 = vmpackc.low %vm995_vm3, %vm991_vm2 }
 0x1cc   : > { %3094 = vmatmul.mubr.msk.bf16.gmra.mrb[28].mxu0 %vm3093_vm7, %v3840_v20  ;;  %vm641_vm6 = vmor %vm465_vm8, %vm577_vm11  ;;  %vm2849_vm11 = vcmask 130112   ;;  %vm2856_vm8 = vcmask 195712   ;;  %vm2877_vm7 = vcmask 392512  }
 0x1cd   : > { %vm645_vm4 = vmor %vm469_vm10, %vm581_vm14  ;;  %vm2863_vm14 = vcmask 261312   ;;  %vm2884_vm10 = vcmask 458112  }
 0x1ce   : > { %vm817_vm1 = vmor %vm641_vm6, %vm753_vm9  ;;  %vm2870_vm9 = vcmask 326912   ;;  %vm2898_vm6 = vcmask 589312  }
 0x1cf   : > { %vm821_vm12 = vmor %vm645_vm4, %vm757_vm15  ;;  %vm2891_vm15 = vcmask 523712   ;;  %vm2905_vm4 = vcmask 654912  }
 0x1d0   : > { %vm993_vm0 = vmor %vm817_vm1, %vm929_vm5  ;;  %vm2912_vm5 = vcmask 720512   ;;  %vm2919_vm1 = vcmask 786112  }
 0x1d1   : > { %vm997_vm2 = vmor %vm821_vm12, %vm933_vm13  ;;  %vm2926_vm13 = vcmask 851712   ;;  %vm2933_vm12 = vcmask 917312  }
 0x1d2   : > { %vm3125_vm3 = vmpackc.low %vm997_vm2, %vm993_vm0  ;;  %vm2940_vm0 = vcmask 982912   ;;  %vm2947_vm2 = vcmask 1048512  }
 0x1d3   : > { %3126 = vmatmul.mubr.msk.bf16.gmra.mrb[28].mxu1 %vm3125_vm3, %v3840_v20 }
 0x1e3   : > { %v3204_v10 = vpop.f32.mrb[0].mxu0 }
 0x1e4   : > { %v3205_v12 = vpop.f32.mrb[1].mxu0 }
 0x1e5   : > { %v3206_v27 = vadd.f32 %v3205_v12, %v3204_v10  ;;  %v3207_v29 = vpop.f32.mrb[2].mxu0  ;;  %v3724_v12 = vld [vmem:[#allocation3 + $0x60] sm:$0xff]  }
 0x1e6   : > { %v3208_v0 = vpop.f32.mrb[3].mxu0  ;;  %3452 = vmatprep.subr.bf16.mxu1 %v3724_v12 }
 0x1e7   : > { %v3209_v30 = vadd.f32 %v3208_v0, %v3207_v29  ;;  %3453 = vmatpush3.bf16.msra.mxu1 %v3724_v12 }
 0x1f0   : > { %v3268_v31 = vpop.f32.mrb[0].mxu1 }
 0x1f1   : > { %v3269_v32 = vpop.f32.mrb[1].mxu1 }
 0x1f2   : > { %v3270_v33 = vadd.f32 %v3269_v32, %v3268_v31  ;;  %v3271_v5 = vpop.f32.mrb[2].mxu1 }
 0x1f3   : > { %v3272_v34 = vpop.f32.mrb[3].mxu1 }
 0x1f4   : > { %v5029_v35 = vadd.f32 %v3270_v33, %v3206_v27  ;;  %v3273_v28 = vadd.f32 %v3272_v34, %v3271_v5 }
 0x1f6   : > { %v5031_v36 = vadd.f32 %v3273_v28, %v3209_v30 }
 0x1f8   : > { %v1545_v20 = vpack.c.bf16 %v5031_v36, %v5029_v35 }
 0x1f9   : > { %v3210_v37 = vpop.f32.mrb[4].mxu0 }
 0x1fa   : > { %v3211_v38 = vpop.f32.mrb[5].mxu0  ;;  %3428 = vmatprep.mubr.bf16.mxu0 %v1545_v20 }
 0x1fb   : > { %v3212_v39 = vadd.f32 %v3211_v38, %v3210_v37  ;;  %v3213_v40 = vpop.f32.mrb[6].mxu0 }
 0x1fc   : > { %v3214_v41 = vpop.f32.mrb[7].mxu0 }
 0x1fd   : > { %v3215_v42 = vadd.f32 %v3214_v41, %v3213_v40 }
 0x1fe   : > { %v3274_v43 = vpop.f32.mrb[4].mxu1 }
 0x1ff   : > { %v3275_v44 = vpop.f32.mrb[5].mxu1 }
 0x200   : > { %v3276_v45 = vadd.f32 %v3275_v44, %v3274_v43  ;;  %v3277_v46 = vpop.f32.mrb[6].mxu1  ;;  %v3726_v43 = vld [vmem:[#allocation3 + $0x70] sm:$0xff]   ;;  %v3727_v44 = vld [vmem:[#allocation3 + $0x78] sm:$0xff]  }
 0x201   : > { %v3278_v47 = vpop.f32.mrb[7].mxu1 }
 0x202   : > { %v5035_v48 = vadd.f32 %v3276_v45, %v3212_v39  ;;  %v3279_v49 = vadd.f32 %v3278_v47, %v3277_v46 }
 0x204   : > { %v5037_v50 = vadd.f32 %v3279_v49, %v3215_v42  ;;  %v3725_v42 = vld [vmem:[#allocation3 + $0x68] sm:$0xff]  }
 0x205   : > { %3454 = vmatprep.subr.bf16.mxu1 %v3725_v42 }
 0x206   : > { %v1546_v51 = vpack.c.bf16 %v5037_v50, %v5035_v48  ;;  %3455 = vmatpush3.bf16.msra.mxu1 %v3725_v42 }
 0x207   : > { %3456 = vmatprep.subr.bf16.mxu1 %v3726_v43 }
 0x208   : > { %3429 = vmatmul.mubr.bf16.vlgmr.msra.gmra.mrb[32].mxu0 %v1546_v51 }
 0x20a   : > { %3457 = vmatpush3.bf16.msra.mxu1 %v3726_v43 }
 0x20b   : > { %3458 = vmatprep.subr.bf16.mxu1 %v3727_v44 }
 0x20e   : > { %3459 = vmatpush3.bf16.msra.mxu1 %v3727_v44 }
 0x213   : > { %v3216_v52 = vpop.f32.mrb[8].mxu0 }
 0x214   : > { %v3217_v53 = vpop.f32.mrb[9].mxu0 }
 0x215   : > { %v3218_v54 = vadd.f32 %v3217_v53, %v3216_v52  ;;  %v3219_v55 = vpop.f32.mrb[10].mxu0 }
 0x216   : > { %v3220_v56 = vpop.f32.mrb[11].mxu0 }
 0x217   : > { %v3221_v57 = vadd.f32 %v3220_v56, %v3219_v55 }
 0x21a   : > { %v3280_v58 = vpop.f32.mrb[8].mxu1 }
 0x21b   : > { %v3281_v59 = vpop.f32.mrb[9].mxu1 }
 0x21c   : > { %v3282_v60 = vadd.f32 %v3281_v59, %v3280_v58  ;;  %v3283_v61 = vpop.f32.mrb[10].mxu1 }
 0x21d   : > { %v3284_v62 = vpop.f32.mrb[11].mxu1 }
 0x21e   : > { %v5041_v63 = vadd.f32 %v3282_v60, %v3218_v54  ;;  %v3285_v2 = vadd.f32 %v3284_v62, %v3283_v61 }
 0x220   : > { %v5043_v4 = vadd.f32 %v3285_v2, %v3221_v57 }
 0x222   : > { %v1547_v8 = vpack.c.bf16 %v5043_v4, %v5041_v63 }
 0x224   : > { %3432 = vmatprep.mubr.bf16.mxu0 %v1547_v8 }
 0x22f   : > { %v3222_v6 = vpop.f32.mrb[12].mxu0 }
 0x230   : > { %v3223_v11 = vpop.f32.mrb[13].mxu0 }
 0x231   : > { %v3224_v16 = vadd.f32 %v3223_v11, %v3222_v6  ;;  %v3225_v17 = vpop.f32.mrb[14].mxu0 }
 0x232   : > { %v3226_v18 = vpop.f32.mrb[15].mxu0 }
 0x233   : > { %v3227_v13 = vadd.f32 %v3226_v18, %v3225_v17 }
 0x236   : > { %v3286_v19 = vpop.f32.mrb[12].mxu1 }
 0x237   : > { %v3287_v21 = vpop.f32.mrb[13].mxu1 }
 0x238   : > { %v3288_v22 = vadd.f32 %v3287_v21, %v3286_v19  ;;  %v3289_v23 = vpop.f32.mrb[14].mxu1 }
 0x239   : > { %v3290_v25 = vpop.f32.mrb[15].mxu1 }
 0x23a   : > { %v5047_v26 = vadd.f32 %v3288_v22, %v3224_v16  ;;  %v3291_v1 = vadd.f32 %v3290_v25, %v3289_v23 }
 0x23c   : > { %v5049_v10 = vadd.f32 %v3291_v1, %v3227_v13 }
 0x23e   : > { %v1548_v27 = vpack.c.bf16 %v5049_v10, %v5047_v26 }
 0x240   : > { %3433 = vmatmul.mubr.bf16.gmra.mrb[36].mxu0 %v1548_v27 }
 0x24b   : > { %v3228_v29 = vpop.f32.mrb[16].mxu0 }
 0x24c   : > { %v3229_v0 = vpop.f32.mrb[17].mxu0 }
 0x24d   : > { %v3230_v30 = vadd.f32 %v3229_v0, %v3228_v29  ;;  %v3231_v31 = vpop.f32.mrb[18].mxu0 }
 0x24e   : > { %v3232_v32 = vpop.f32.mrb[19].mxu0 }
 0x24f   : > { %v3233_v33 = vadd.f32 %v3232_v32, %v3231_v31 }
 0x252   : > { %v3292_v5 = vpop.f32.mrb[16].mxu1 }
 0x253   : > { %v3293_v34 = vpop.f32.mrb[17].mxu1 }
 0x254   : > { %v3294_v28 = vadd.f32 %v3293_v34, %v3292_v5  ;;  %v3295_v37 = vpop.f32.mrb[18].mxu1 }
 0x255   : > { %v3296_v20 = vpop.f32.mrb[19].mxu1 }
 0x256   : > { %v5053_v38 = vadd.f32 %v3294_v28, %v3230_v30  ;;  %v3297_v39 = vadd.f32 %v3296_v20, %v3295_v37  ;;  %v5080_v37 = vld [vmem:[%s5464_s3] ss:$0 sm:$0xff] }
 0x258   : > { %v5055_v40 = vadd.f32 %v3297_v39, %v3233_v33 }
 0x25a   : > { %v1549_v41 = vpack.c.bf16 %v5055_v40, %v5053_v38 }
 0x25c   : > { %3436 = vmatprep.mubr.bf16.mxu0 %v1549_v41 }
 0x267   : > { %v3234_v45 = vpop.f32.mrb[20].mxu0 }
 0x268   : > { %v3235_v46 = vpop.f32.mrb[21].mxu0 }
 0x269   : > { %v3236_v47 = vadd.f32 %v3235_v46, %v3234_v45  ;;  %v3237_v49 = vpop.f32.mrb[22].mxu0 }
 0x26a   : > { %v3238_v51 = vpop.f32.mrb[23].mxu0 }
 0x26b   : > { %v3239_v52 = vadd.f32 %v3238_v51, %v3237_v49 }
 0x26e   : > { %v3298_v53 = vpop.f32.mrb[20].mxu1 }
 0x26f   : > { %v3299_v54 = vpop.f32.mrb[21].mxu1 }
 0x270   : > { %v3300_v55 = vadd.f32 %v3299_v54, %v3298_v53  ;;  %v3301_v56 = vpop.f32.mrb[22].mxu1 }
 0x271   : > { %v3302_v57 = vpop.f32.mrb[23].mxu1 }
 0x272   : > { %v5059_v58 = vadd.f32 %v3300_v55, %v3236_v47  ;;  %v3303_v59 = vadd.f32 %v3302_v57, %v3301_v56 }
 0x274   : > { %v5061_v60 = vadd.f32 %v3303_v59, %v3239_v52 }
 0x276   : > { %v1550_v61 = vpack.c.bf16 %v5061_v60, %v5059_v58 }
 0x278   : > { %3437 = vmatmul.mubr.bf16.gmra.mrb[40].mxu0 %v1550_v61  ;;  %v3728_v61 = vld [vmem:[#allocation3 + $0x80] sm:$0xff]  }
 0x279   : > { %3476 = vmatprep.subr.bf16.mxu0 %v3728_v61 }
 0x27a   : > { %3477 = vmatpush3.bf16.msra.mxu0 %v3728_v61 }
 0x283   : > { %v3240_v62 = vpop.f32.mrb[24].mxu0 }
 0x284   : > { %v3241_v2 = vpop.f32.mrb[25].mxu0 }
 0x285   : > { %v3242_v8 = vadd.f32 %v3241_v2, %v3240_v62  ;;  %v3243_v6 = vpop.f32.mrb[26].mxu0  ;;  %v3729_v62 = vld [vmem:[#allocation3 + $0x88] sm:$0xff]  }
 0x286   : > { %v3244_v11 = vpop.f32.mrb[27].mxu0  ;;  %3478 = vmatprep.subr.bf16.mxu0 %v3729_v62 }
 0x287   : > { %v3245_v14 = vadd.f32 %v3244_v11, %v3243_v6  ;;  %v3730_v11 = vld [vmem:[#allocation3 + $0x90] sm:$0xff]   ;;  %3479 = vmatpush3.bf16.msra.mxu0 %v3729_v62 }
 0x288   : > { %3480 = vmatprep.subr.bf16.mxu0 %v3730_v11 }
 0x28a   : > { %v3304_v15 = vpop.f32.mrb[24].mxu1 }
 0x28b   : > { %v3305_v16 = vpop.f32.mrb[25].mxu1  ;;  %3481 = vmatpush3.bf16.msra.mxu0 %v3730_v11 }
 0x28c   : > { %v3306_v17 = vadd.f32 %v3305_v16, %v3304_v15  ;;  %v3307_v18 = vpop.f32.mrb[26].mxu1 }
 0x28d   : > { %v3308_v13 = vpop.f32.mrb[27].mxu1 }
 0x28e   : > { %v5065_v9 = vadd.f32 %v3306_v17, %v3242_v8  ;;  %v3309_v19 = vadd.f32 %v3308_v13, %v3307_v18 }
 0x290   : > { %v5067_v21 = vadd.f32 %v3309_v19, %v3245_v14 }
 0x292   : > { %v1551_v22 = vpack.c.bf16 %v5067_v21, %v5065_v9 }
 0x294   : > { %3440 = vmatprep.mubr.bf16.mxu0 %v1551_v22 }
 0x29f   : > { %v3246_v23 = vpop.f32.mrb[28].mxu0 }
 0x2a0   : > { %v3247_v24 = vpop.f32.mrb[29].mxu0 }
 0x2a1   : > { %v3248_v25 = vadd.f32 %v3247_v24, %v3246_v23  ;;  %v3249_v1 = vpop.f32.mrb[30].mxu0  ;;  %v3731_v23 = vld [vmem:[#allocation3 + $0x98] sm:$0xff]  }
 0x2a2   : > { %v3250_v12 = vpop.f32.mrb[31].mxu0  ;;  %3482 = vmatprep.subr.bf16.mxu0 %v3731_v23 }
 0x2a3   : > { %v3251_v27 = vadd.f32 %v3250_v12, %v3249_v1  ;;  %3483 = vmatpush3.bf16.msra.mxu0 %v3731_v23 }
 0x2a6   : > { %v3310_v29 = vpop.f32.mrb[28].mxu1 }
 0x2a7   : > { %v3311_v0 = vpop.f32.mrb[29].mxu1 }
 0x2a8   : > { %v3312_v30 = vadd.f32 %v3311_v0, %v3310_v29  ;;  %v3313_v31 = vpop.f32.mrb[30].mxu1  ;;  %v3732_v29 = vld [vmem:[#allocation3 + $0xa0] sm:$0xff]  }
 0x2a9   : > { %v3314_v32 = vpop.f32.mrb[31].mxu1  ;;  %3484 = vmatprep.subr.bf16.mxu0 %v3732_v29 }
 0x2aa   : > { %v5071_v33 = vadd.f32 %v3312_v30, %v3248_v25  ;;  %v3315_v5 = vadd.f32 %v3314_v32, %v3313_v31  ;;  %3485 = vmatpush3.bf16.msra.mxu0 %v3732_v29  ;;  %v3733_v31 = vld [vmem:[#allocation3 + $0xa8] sm:$0xff]   ;;  %v3734_v32 = vld [vmem:[#allocation3 + $0xb0] sm:$0xff]  }
 0x2ab   : > { %3486 = vmatprep.subr.bf16.mxu0 %v3733_v31 }
 0x2ac   : > { %v5073_v34 = vadd.f32 %v3315_v5, %v3251_v27  ;;  %v3735_v5 = vld [vmem:[#allocation3 + $0xb8] sm:$0xff]  }
 0x2ae   : > { %v1552_v28 = vpack.c.bf16 %v5073_v34, %v5071_v33  ;;  %3487 = vmatpush3.bf16.msra.mxu0 %v3733_v31 }
 0x2af   : > { %3488 = vmatprep.subr.bf16.mxu0 %v3734_v32 }
 0x2b0   : > { %3441 = vmatmul.mubr.bf16.gmra.mrb[44].mxu0 %v1552_v28 }
 0x2b2   : > { %3489 = vmatpush3.bf16.msra.mxu0 %v3734_v32  ;;  %v5181_v32 = vld [vmem:[%s5464_s3 + $0x1] ss:$0 sm:$0xff] }
 0x2b3   : > { %3490 = vmatprep.subr.bf16.mxu0 %v3735_v5 }
 0x2b6   : > { %3491 = vmatpush3.bf16.msra.mxu0 %v3735_v5 }
 0x2db   : > { %v3430_v20 = vpop.f32.mrb[32].mxu0 }
 0x2dc   : > { %v1667_v39 = vadd.f32 %v3430_v20, %v5080_v37  ;;  %v1658_v41 = vpop.f32.mrb[33].mxu0 }
 0x2dd   : > { %v1659_v42 = vadd.f32 %v5080_v37, %v1658_v41  ;;  %v3431_v43 = vpop.f32.mrb[34].mxu0 }
 0x2de   : > { %v1670_v44 = vadd.f32 %v3431_v43, %v5080_v37  ;;  %v1661_v45 = vpop.f32.mrb[35].mxu0  ;;  %v1723_v49 = vmul.f32 %v1667_v39, %v5035_v48 }
 0x2df   : > { %v1721_v46 = vmul.f32 %v1659_v42, %v5029_v35  ;;  %v1662_v47 = vadd.f32 %v5080_v37, %v1661_v45 }
 0x2e0   : > { %v1724_v51 = vmul.f32 %v1670_v44, %v5037_v50  ;;  %v5100_v56 = vadd.f32 %v1723_v49, %v5035_v48 }
 0x2e1   : > { %v1722_v52 = vmul.f32 %v1662_v47, %v5031_v36  ;;  %v5094_v54 = vadd.f32 %v1721_v46, %v5029_v35 }
 0x2e2   : > { %v5091_v53 = vadd.f32 %v1724_v51, %v5037_v50 }
 0x2e3   : > { %v5097_v55 = vadd.f32 %v1722_v52, %v5031_v36 }
 0x2e4   : > { %v1754_v59 = vpack.c.bf16 %v5091_v53, %v5100_v56 }
 0x2e5   : > { %v1753_v57 = vpack.c.bf16 %v5097_v55, %v5094_v54 }
 0x2e7   : > { %3460 = vmatprep.mubr.bf16.mxu1 %v1753_v57 }
 0x2e8   : > { %3461 = vmatmul.mubr.bf16.vlgmr.msra.gmra.mrb[32].mxu1 %v1754_v59 }
 0x313   : > { %v3434_v2 = vpop.f32.mrb[36].mxu0 }
 0x314   : > { %v1683_v8 = vadd.f32 %v3434_v2, %v5080_v37  ;;  %v1674_v6 = vpop.f32.mrb[37].mxu0 }
 0x315   : > { %v1675_v14 = vadd.f32 %v5080_v37, %v1674_v6  ;;  %v3435_v15 = vpop.f32.mrb[38].mxu0 }
 0x316   : > { %v1686_v16 = vadd.f32 %v3435_v15, %v5080_v37  ;;  %v1677_v17 = vpop.f32.mrb[39].mxu0  ;;  %v1727_v19 = vmul.f32 %v1683_v8, %v5047_v26 }
 0x317   : > { %v1725_v18 = vmul.f32 %v1675_v14, %v5041_v63  ;;  %v1678_v13 = vadd.f32 %v5080_v37, %v1677_v17 }
 0x318   : > { %v1728_v22 = vmul.f32 %v1686_v16, %v5049_v10  ;;  %v5124_v27 = vadd.f32 %v1727_v19, %v5047_v26 }
 0x319   : > { %v1726_v24 = vmul.f32 %v1678_v13, %v5043_v4  ;;  %v5118_v1 = vadd.f32 %v1725_v18, %v5041_v63 }
 0x31a   : > { %v5115_v25 = vadd.f32 %v1728_v22, %v5049_v10 }
 0x31b   : > { %v5121_v12 = vadd.f32 %v1726_v24, %v5043_v4 }
 0x31c   : > { %v1756_v30 = vpack.c.bf16 %v5115_v25, %v5124_v27 }
 0x31d   : > { %v1755_v0 = vpack.c.bf16 %v5121_v12, %v5118_v1 }
 0x31f   : > { %3464 = vmatprep.mubr.bf16.mxu1 %v1755_v0 }
 0x320   : > { %3465 = vmatmul.mubr.bf16.gmra.mrb[36].mxu1 %v1756_v30 }
 0x34b   : > { %v3438_v28 = vpop.f32.mrb[40].mxu0 }
 0x34c   : > { %v1699_v20 = vadd.f32 %v3438_v28, %v5080_v37  ;;  %v1690_v39 = vpop.f32.mrb[41].mxu0 }
 0x34d   : > { %v1691_v41 = vadd.f32 %v5080_v37, %v1690_v39  ;;  %v3439_v42 = vpop.f32.mrb[42].mxu0 }
 0x34e   : > { %v1702_v43 = vadd.f32 %v3439_v42, %v5080_v37  ;;  %v1693_v44 = vpop.f32.mrb[43].mxu0  ;;  %v1731_v47 = vmul.f32 %v1699_v20, %v5059_v58 }
 0x34f   : > { %v1729_v45 = vmul.f32 %v1691_v41, %v5053_v38  ;;  %v1694_v46 = vadd.f32 %v5080_v37, %v1693_v44 }
 0x350   : > { %v1732_v49 = vmul.f32 %v1702_v43, %v5061_v60  ;;  %v5148_v61 = vadd.f32 %v1731_v47, %v5059_v58 }
 0x351   : > { %v1730_v51 = vmul.f32 %v1694_v46, %v5055_v40  ;;  %v5142_v57 = vadd.f32 %v1729_v45, %v5053_v38 }
 0x352   : > { %v5139_v52 = vadd.f32 %v1732_v49, %v5061_v60 }
 0x353   : > { %v5145_v59 = vadd.f32 %v1730_v51, %v5055_v40 }
 0x354   : > { %v1758_v2 = vpack.c.bf16 %v5139_v52, %v5148_v61 }
 0x355   : > { %v1757_v62 = vpack.c.bf16 %v5145_v59, %v5142_v57 }
 0x357   : > { %3468 = vmatprep.mubr.bf16.mxu1 %v1757_v62 }
 0x358   : > { %3469 = vmatmul.mubr.bf16.gmra.mrb[40].mxu1 %v1758_v2 }
 0x383   : > { %v3442_v8 = vpop.f32.mrb[44].mxu0 }
 0x384   : > { %v1715_v6 = vadd.f32 %v3442_v8, %v5080_v37  ;;  %v1706_v11 = vpop.f32.mrb[45].mxu0 }
 0x385   : > { %v1707_v14 = vadd.f32 %v5080_v37, %v1706_v11  ;;  %v3443_v15 = vpop.f32.mrb[46].mxu0 }
 0x386   : > { %v1718_v16 = vadd.f32 %v3443_v15, %v5080_v37  ;;  %v1709_v17 = vpop.f32.mrb[47].mxu0  ;;  %v1735_v19 = vmul.f32 %v1715_v6, %v5071_v33 }
 0x387   : > { %v1733_v18 = vmul.f32 %v1707_v14, %v5065_v9  ;;  %v1710_v13 = vadd.f32 %v5080_v37, %v1709_v17  ;;  %v3736_v14 = vld [vmem:[#allocation5] sm:$0xff]  }
 0x388   : > { %v1736_v22 = vmul.f32 %v1718_v16, %v5073_v34  ;;  %v5172_v30 = vadd.f32 %v1735_v19, %v5071_v33  ;;  %3508 = vmatprep.subr.bf16.mxu1 %v3736_v14  ;;  %v3738_v16 = vld [vmem:[#allocation5 + $0x10] sm:$0xff]  }
 0x389   : > { %v1734_v23 = vmul.f32 %v1710_v13, %v5067_v21  ;;  %v5166_v29 = vadd.f32 %v1733_v18, %v5065_v9  ;;  %3509 = vmatpush3.bf16.msra.mxu1 %v3736_v14 }
 0x38a   : > { %v5163_v24 = vadd.f32 %v1736_v22, %v5073_v34 }
 0x38b   : > { %v5169_v0 = vadd.f32 %v1734_v23, %v5067_v21 }
 0x38c   : > { %v1760_v31 = vpack.c.bf16 %v5163_v24, %v5172_v30 }
 0x38d   : > { %v1759_v37 = vpack.c.bf16 %v5169_v0, %v5166_v29 }
 0x38f   : > { %3472 = vmatprep.mubr.bf16.mxu1 %v1759_v37 }
 0x390   : > { %3473 = vmatmul.mubr.bf16.gmra.mrb[44].mxu1 %v1760_v31  ;;  %v3739_v31 = vld [vmem:[#allocation5 + $0x18] sm:$0xff]  }
 0x3bb   : > { %v3462_v5 = vpop.f32.mrb[32].mxu1 }
 0x3bc   : > { %v1877_v28 = vadd.f32 %v3462_v5, %v5181_v32  ;;  %v1868_v20 = vpop.f32.mrb[33].mxu1 }
 0x3bd   : > { %v1869_v39 = vadd.f32 %v5181_v32, %v1868_v20  ;;  %v3463_v41 = vpop.f32.mrb[34].mxu1 }
 0x3be   : > { %v1880_v42 = vadd.f32 %v3463_v41, %v5181_v32  ;;  %v1871_v43 = vpop.f32.mrb[35].mxu1  ;;  %v1933_v46 = vmul.f32 %v1877_v28, %v5035_v48 }
 0x3bf   : > { %v1931_v44 = vmul.f32 %v1869_v39, %v5029_v35  ;;  %v1872_v45 = vadd.f32 %v5181_v32, %v1871_v43 }
 0x3c0   : > { %v1934_v47 = vmul.f32 %v1880_v42, %v5037_v50  ;;  %v5201_v8 = vadd.f32 %v1933_v46, %v5100_v56  ;;  %v3740_v42 = vld [vmem:[#allocation5 + $0x20] sm:$0xff]  }
 0x3c1   : > { %v1932_v49 = vmul.f32 %v1872_v45, %v5031_v36  ;;  %v5195_v62 = vadd.f32 %v1931_v44, %v5094_v54 }
 0x3c2   : > { %v5192_v51 = vadd.f32 %v1934_v47, %v5091_v53  ;;  %v3737_v53 = vld [vmem:[#allocation5 + $0x8] sm:$0xff]  }
 0x3c3   : > { %v5198_v2 = vadd.f32 %v1932_v49, %v5097_v55  ;;  %3510 = vmatprep.subr.bf16.mxu1 %v3737_v53 }
 0x3c4   : > { %v1964_v11 = vpack.c.bf16 %v5192_v51, %v5201_v8  ;;  %3511 = vmatpush3.bf16.msra.mxu1 %v3737_v53 }
 0x3c5   : > { %v1963_v6 = vpack.c.bf16 %v5198_v2, %v5195_v62  ;;  %3512 = vmatprep.subr.bf16.mxu1 %v3738_v16 }
 0x3c7   : > { %3492 = vmatprep.mubr.bf16.mxu0 %v1963_v6 }
 0x3c8   : > { %3493 = vmatmul.mubr.bf16.vlgmr.msra.gmra.mrb[48].mxu0 %v1964_v11  ;;  %3513 = vmatpush3.bf16.msra.mxu1 %v3738_v16 }
 0x3c9   : > { %3514 = vmatprep.subr.bf16.mxu1 %v3739_v31 }
 0x3cc   : > { %3515 = vmatpush3.bf16.msra.mxu1 %v3739_v31 }
 0x3cd   : > { %3516 = vmatprep.subr.bf16.mxu1 %v3740_v42 }
 0x3d0   : > { %3517 = vmatpush3.bf16.msra.mxu1 %v3740_v42 }
 0x3f3   : > { %v3466_v15 = vpop.f32.mrb[36].mxu1 }
 0x3f4   : > { %v1893_v54 = vadd.f32 %v3466_v15, %v5181_v32  ;;  %v1884_v55 = vpop.f32.mrb[37].mxu1 }
 0x3f5   : > { %v1885_v56 = vadd.f32 %v5181_v32, %v1884_v55  ;;  %v3467_v17 = vpop.f32.mrb[38].mxu1 }
 0x3f6   : > { %v1896_v18 = vadd.f32 %v3467_v17, %v5181_v32  ;;  %v1887_v13 = vpop.f32.mrb[39].mxu1  ;;  %v1937_v23 = vmul.f32 %v1893_v54, %v5047_v26 }
 0x3f7   : > { %v1935_v19 = vmul.f32 %v1885_v56, %v5041_v63  ;;  %v1888_v22 = vadd.f32 %v5181_v32, %v1887_v13 }
 0x3f8   : > { %v1938_v37 = vmul.f32 %v1896_v18, %v5049_v10  ;;  %v5225_v41 = vadd.f32 %v1937_v23, %v5124_v27 }
 0x3f9   : > { %v1936_v5 = vmul.f32 %v1888_v22, %v5043_v4  ;;  %v5219_v20 = vadd.f32 %v1935_v19, %v5118_v1  ;;  %v3742_v1 = vld [vmem:[#allocation5 + $0x30] sm:$0xff]  }
 0x3fa   : > { %v5216_v28 = vadd.f32 %v1938_v37, %v5115_v25  ;;  %v3741_v25 = vld [vmem:[#allocation5 + $0x28] sm:$0xff]  }
 0x3fb   : > { %v5222_v39 = vadd.f32 %v1936_v5, %v5121_v12  ;;  %3518 = vmatprep.subr.bf16.mxu1 %v3741_v25  ;;  %v3743_v12 = vld [vmem:[#allocation5 + $0x38] sm:$0xff]  }
 0x3fc   : > { %v1966_v44 = vpack.c.bf16 %v5216_v28, %v5225_v41  ;;  %3519 = vmatpush3.bf16.msra.mxu1 %v3741_v25 }
 0x3fd   : > { %v1965_v43 = vpack.c.bf16 %v5222_v39, %v5219_v20  ;;  %3520 = vmatprep.subr.bf16.mxu1 %v3742_v1 }
 0x3ff   : > { %3496 = vmatprep.mubr.bf16.mxu0 %v1965_v43 }
 0x400   : > { %3497 = vmatmul.mubr.bf16.gmra.mrb[52].mxu0 %v1966_v44  ;;  %3521 = vmatpush3.bf16.msra.mxu1 %v3742_v1 }
 0x401   : > { %3522 = vmatprep.subr.bf16.mxu1 %v3743_v12 }
 0x404   : > { %3523 = vmatpush3.bf16.msra.mxu1 %v3743_v12 }
 0x42b   : > { %v3470_v27 = vpop.f32.mrb[40].mxu1 }
 0x42c   : > { %v1909_v45 = vadd.f32 %v3470_v27, %v5181_v32  ;;  %v1900_v46 = vpop.f32.mrb[41].mxu1 }
 0x42d   : > { %v1901_v47 = vadd.f32 %v5181_v32, %v1900_v46  ;;  %v3471_v49 = vpop.f32.mrb[42].mxu1 }
 0x42e   : > { %v1912_v6 = vadd.f32 %v3471_v49, %v5181_v32  ;;  %v1903_v11 = vpop.f32.mrb[43].mxu1  ;;  %v1941_v15 = vmul.f32 %v1909_v45, %v5059_v58 }
 0x42f   : > { %v1939_v14 = vmul.f32 %v1901_v47, %v5053_v38  ;;  %v1904_v53 = vadd.f32 %v5181_v32, %v1903_v11 }
 0x430   : > { %v1942_v54 = vmul.f32 %v1912_v6, %v5061_v60  ;;  %v5249_v18 = vadd.f32 %v1941_v15, %v5148_v61 }
 0x431   : > { %v1940_v55 = vmul.f32 %v1904_v53, %v5055_v40  ;;  %v5243_v56 = vadd.f32 %v1939_v14, %v5142_v57 }
 0x432   : > { %v5240_v16 = vadd.f32 %v1942_v54, %v5139_v52 }
 0x433   : > { %v5246_v17 = vadd.f32 %v1940_v55, %v5145_v59 }
 0x434   : > { %v1968_v19 = vpack.c.bf16 %v5240_v16, %v5249_v18 }
 0x435   : > { %v1967_v13 = vpack.c.bf16 %v5246_v17, %v5243_v56 }
 0x437   : > { %3500 = vmatprep.mubr.bf16.mxu0 %v1967_v13 }
 0x438   : > { %3501 = vmatmul.mubr.bf16.gmra.mrb[56].mxu0 %v1968_v19 }
 0x463   : > { %v3474_v22 = vpop.f32.mrb[44].mxu1 }
 0x464   : > { %v1925_v52 = vadd.f32 %v3474_v22, %v5181_v32  ;;  %v1916_v23 = vpop.f32.mrb[45].mxu1 }
 0x465   : > { %v1917_v57 = vadd.f32 %v5181_v32, %v1916_v23  ;;  %v3475_v37 = vpop.f32.mrb[46].mxu1  ;;  %v3744_v23 = vld [vmem:[#allocation5 + $0x40] sm:$0xff]  }
 0x466   : > { %v1928_v59 = vadd.f32 %v3475_v37, %v5181_v32  ;;  %v1919_v31 = vpop.f32.mrb[47].mxu1  ;;  %v1945_v42 = vmul.f32 %v1925_v52, %v5071_v33  ;;  %3540 = vmatprep.subr.bf16.mxu0 %v3744_v23 }
 0x467   : > { %v1943_v61 = vmul.f32 %v1917_v57, %v5065_v9  ;;  %v1920_v5 = vadd.f32 %v5181_v32, %v1919_v31  ;;  %3541 = vmatpush3.bf16.msra.mxu0 %v3744_v23 }
 0x468   : > { %v1946_v43 = vmul.f32 %v1928_v59, %v5073_v34  ;;  %v5273_v27 = vadd.f32 %v1945_v42, %v5172_v30  ;;  %v3747_v42 = vld [vmem:[#allocation5 + $0x58] sm:$0xff]  }
 0x469   : > { %v1944_v44 = vmul.f32 %v1920_v5, %v5067_v21  ;;  %v5267_v1 = vadd.f32 %v1943_v61, %v5166_v29 }
 0x46a   : > { %v5264_v25 = vadd.f32 %v1946_v43, %v5163_v24  ;;  %v5282_v24 = vld [vmem:[%s5464_s3 + $0x2] ss:$0 sm:$0xff] }
 0x46b   : > { %v5270_v12 = vadd.f32 %v1944_v44, %v5169_v0 }
 0x46c   : > { %v1970_v45 = vpack.c.bf16 %v5264_v25, %v5273_v27 }
 0x46d   : > { %v1969_v32 = vpack.c.bf16 %v5270_v12, %v5267_v1 }
 0x46f   : > { %3504 = vmatprep.mubr.bf16.mxu0 %v1969_v32 }
 0x470   : > { %3505 = vmatmul.mubr.bf16.gmra.mrb[60].mxu0 %v1970_v45 }
 0x49b   : > { %v3494_v29 = vpop.f32.mrb[48].mxu0 }
 0x49c   : > { %v2087_v0 = vadd.f32 %v3494_v29, %v5282_v24  ;;  %v2078_v46 = vpop.f32.mrb[49].mxu0 }
 0x49d   : > { %v2079_v30 = vadd.f32 %v5282_v24, %v2078_v46  ;;  %v3495_v47 = vpop.f32.mrb[50].mxu0 }
 0x49e   : > { %v2143_v49 = vmul.f32 %v2087_v0, %v5035_v48  ;;  %v2090_v6 = vadd.f32 %v3495_v47, %v5282_v24  ;;  %v2081_v11 = vpop.f32.mrb[51].mxu0 }
 0x49f   : > { %v2141_v14 = vmul.f32 %v2079_v30, %v5029_v35  ;;  %v2082_v53 = vadd.f32 %v5282_v24, %v2081_v11  ;;  %v3745_v35 = vld [vmem:[#allocation5 + $0x48] sm:$0xff]  }
 0x4a0   : > { %v2144_v15 = vmul.f32 %v2090_v6, %v5037_v50  ;;  %v2159_v55 = vadd.f32 %v2143_v49, %v5201_v8  ;;  %3542 = vmatprep.subr.bf16.mxu0 %v3745_v35  ;;  %v3746_v8 = vld [vmem:[#allocation5 + $0x50] sm:$0xff]  }
 0x4a1   : > { %v2142_v54 = vmul.f32 %v2082_v53, %v5031_v36  ;;  %v2157_v19 = vadd.f32 %v2141_v14, %v5195_v62  ;;  %3543 = vmatpush3.bf16.msra.mxu0 %v3745_v35 }
 0x4a2   : > { %v2160_v13 = vadd.f32 %v2144_v15, %v5192_v51  ;;  %3544 = vmatprep.subr.bf16.mxu0 %v3746_v8 }
 0x4a3   : > { %v2158_v22 = vadd.f32 %v2142_v54, %v5198_v2 }
 0x4a4   : > { %v2174_v48 = vpack.c.bf16 %v2160_v13, %v2159_v55 }
 0x4a5   : > { %v2173_v52 = vpack.c.bf16 %v2158_v22, %v2157_v19  ;;  %3545 = vmatpush3.bf16.msra.mxu0 %v3746_v8 }
 0x4a6   : > { %3546 = vmatprep.subr.bf16.mxu0 %v3747_v42 }
 0x4a7   : > { %3524 = vmatprep.mubr.bf16.mxu1 %v2173_v52 }
 0x4a8   : > { %3525 = vmatmul.mubr.bf16.vlgmr.msra.gmra.mrb[48].mxu1 %v2174_v48 }
 0x4a9   : > { %3547 = vmatpush3.bf16.msra.mxu0 %v3747_v42 }
 0x4d3   : > { %v3498_v57 = vpop.f32.mrb[52].mxu0 }
 0x4d4   : > { %v2103_v50 = vadd.f32 %v3498_v57, %v5282_v24  ;;  %v2094_v36 = vpop.f32.mrb[53].mxu0 }
 0x4d5   : > { %v2095_v51 = vadd.f32 %v5282_v24, %v2094_v36  ;;  %v3499_v37 = vpop.f32.mrb[54].mxu0 }
 0x4d6   : > { %v2147_v62 = vmul.f32 %v2103_v50, %v5047_v26  ;;  %v2106_v2 = vadd.f32 %v3499_v37, %v5282_v24  ;;  %v2097_v59 = vpop.f32.mrb[55].mxu0 }
 0x4d7   : > { %v2145_v31 = vmul.f32 %v2095_v51, %v5041_v63  ;;  %v2098_v61 = vadd.f32 %v5282_v24, %v2097_v59  ;;  %v3748_v63 = vld [vmem:[#allocation5 + $0x60] sm:$0xff]  }
 0x4d8   : > { %v2148_v5 = vmul.f32 %v2106_v2, %v5049_v10  ;;  %v2163_v44 = vadd.f32 %v2147_v62, %v5225_v41  ;;  %3548 = vmatprep.subr.bf16.mxu0 %v3748_v63  ;;  %v3749_v10 = vld [vmem:[#allocation5 + $0x68] sm:$0xff]   ;;  %v3751_v41 = vld [vmem:[#allocation5 + $0x78] sm:$0xff]  }
 0x4d9   : > { %v2146_v43 = vmul.f32 %v2098_v61, %v5043_v4  ;;  %v2161_v26 = vadd.f32 %v2145_v31, %v5219_v20  ;;  %3549 = vmatpush3.bf16.msra.mxu0 %v3748_v63  ;;  %v3750_v4 = vld [vmem:[#allocation5 + $0x70] sm:$0xff]  }
 0x4da   : > { %v2164_v32 = vadd.f32 %v2148_v5, %v5216_v28  ;;  %3550 = vmatprep.subr.bf16.mxu0 %v3749_v10 }
 0x4db   : > { %v2162_v45 = vadd.f32 %v2146_v43, %v5222_v39  ;;  %v3752_v43 = vld [vmem:[#allocation5 + $0x80] sm:$0xff]  }
 0x4dc   : > { %v2176_v29 = vpack.c.bf16 %v2164_v32, %v2163_v44  ;;  %v3753_v44 = vld [vmem:[#allocation5 + $0x88] sm:$0xff]   ;;  %3572 = vmatprep.subr.bf16.mxu1 %v3752_v43  ;;  %v3754_v32 = vld [vmem:[#allocation5 + $0x90] sm:$0xff]  }
 0x4dd   : > { %v2175_v0 = vpack.c.bf16 %v2162_v45, %v2161_v26  ;;  %3551 = vmatpush3.bf16.msra.mxu0 %v3749_v10  ;;  %3573 = vmatpush3.bf16.msra.mxu1 %v3752_v43 }
 0x4de   : > { %3552 = vmatprep.subr.bf16.mxu0 %v3750_v4  ;;  %3574 = vmatprep.subr.bf16.mxu1 %v3753_v44 }
 0x4df   : > { %3528 = vmatprep.mubr.bf16.mxu1 %v2175_v0 }
 0x4e0   : > { %3529 = vmatmul.mubr.bf16.gmra.mrb[52].mxu1 %v2176_v29 }
 0x4e1   : > { %3553 = vmatpush3.bf16.msra.mxu0 %v3750_v4  ;;  %3575 = vmatpush3.bf16.msra.mxu1 %v3753_v44 }
 0x4e2   : > { %3554 = vmatprep.subr.bf16.mxu0 %v3751_v41  ;;  %3576 = vmatprep.subr.bf16.mxu1 %v3754_v32 }
 0x4e5   : > { %3555 = vmatpush3.bf16.msra.mxu0 %v3751_v41  ;;  %v3755_v41 = vld [vmem:[#allocation5 + $0x98] sm:$0xff]   ;;  %3577 = vmatpush3.bf16.msra.mxu1 %v3754_v32 }
 0x4e6   : > { %3578 = vmatprep.subr.bf16.mxu1 %v3755_v41 }
 0x4e9   : > { %3579 = vmatpush3.bf16.msra.mxu1 %v3755_v41 }
 0x50b   : > { %v3502_v28 = vpop.f32.mrb[56].mxu0 }
 0x50c   : > { %v2119_v20 = vadd.f32 %v3502_v28, %v5282_v24  ;;  %v2110_v39 = vpop.f32.mrb[57].mxu0 }
 0x50d   : > { %v2111_v46 = vadd.f32 %v5282_v24, %v2110_v39  ;;  %v3503_v30 = vpop.f32.mrb[58].mxu0 }
 0x50e   : > { %v2151_v47 = vmul.f32 %v2119_v20, %v5059_v58  ;;  %v2122_v49 = vadd.f32 %v3503_v30, %v5282_v24  ;;  %v2113_v6 = vpop.f32.mrb[59].mxu0 }
 0x50f   : > { %v2149_v11 = vmul.f32 %v2111_v46, %v5053_v38  ;;  %v2114_v14 = vadd.f32 %v5282_v24, %v2113_v6 }
 0x510   : > { %v2152_v53 = vmul.f32 %v2122_v49, %v5061_v60  ;;  %v2167_v54 = vadd.f32 %v2151_v47, %v5249_v18  ;;  %v3756_v49 = vld [vmem:[#allocation5 + $0xa0] sm:$0xff]  }
 0x511   : > { %v2150_v15 = vmul.f32 %v2114_v14, %v5055_v40  ;;  %v2165_v13 = vadd.f32 %v2149_v11, %v5243_v56  ;;  %3580 = vmatprep.subr.bf16.mxu1 %v3756_v49  ;;  %v3757_v11 = vld [vmem:[#allocation5 + $0xa8] sm:$0xff]   ;;  %v3758_v14 = vld [vmem:[#allocation5 + $0xb0] sm:$0xff]  }
 0x512   : > { %v2168_v55 = vadd.f32 %v2152_v53, %v5240_v16  ;;  %3581 = vmatpush3.bf16.msra.mxu1 %v3756_v49  ;;  %v3759_v53 = vld [vmem:[#allocation5 + $0xb8] sm:$0xff]  }
 0x513   : > { %v2166_v19 = vadd.f32 %v2150_v15, %v5246_v17  ;;  %3582 = vmatprep.subr.bf16.mxu1 %v3757_v11 }
 0x514   : > { %v2178_v58 = vpack.c.bf16 %v2168_v55, %v2167_v54 }
 0x515   : > { %v2177_v22 = vpack.c.bf16 %v2166_v19, %v2165_v13 }
 0x516   : > { %3583 = vmatpush3.bf16.msra.mxu1 %v3757_v11 }
 0x517   : > { %3532 = vmatprep.mubr.bf16.mxu1 %v2177_v22  ;;  %3584 = vmatprep.subr.bf16.mxu1 %v3758_v14 }
 0x518   : > { %3533 = vmatmul.mubr.bf16.gmra.mrb[56].mxu1 %v2178_v58 }
 0x51a   : > { %3585 = vmatpush3.bf16.msra.mxu1 %v3758_v14 }
 0x51b   : > { %3586 = vmatprep.subr.bf16.mxu1 %v3759_v53 }
 0x51e   : > { %3587 = vmatpush3.bf16.msra.mxu1 %v3759_v53 }
 0x543   : > { %v3506_v48 = vpop.f32.mrb[60].mxu0 }
 0x544   : > { %v2135_v38 = vadd.f32 %v3506_v48, %v5282_v24  ;;  %v2126_v52 = vpop.f32.mrb[61].mxu0 }
 0x545   : > { %v2127_v60 = vadd.f32 %v5282_v24, %v2126_v52  ;;  %v3507_v23 = vpop.f32.mrb[62].mxu0 }
 0x546   : > { %v2155_v40 = vmul.f32 %v2135_v38, %v5071_v33  ;;  %v2138_v18 = vadd.f32 %v3507_v23, %v5282_v24  ;;  %v2129_v16 = vpop.f32.mrb[63].mxu0 }
 0x547   : > { %v2153_v56 = vmul.f32 %v2127_v60, %v5065_v9  ;;  %v2130_v17 = vadd.f32 %v5282_v24, %v2129_v16  ;;  %v5335_v9 = vld [vmem:[%s5466_s5] ss:$0 sm:$0xff] }
 0x548   : > { %v2156_v35 = vmul.f32 %v2138_v18, %v5073_v34  ;;  %v2171_v50 = vadd.f32 %v2155_v40, %v5273_v27 }
 0x549   : > { %v2154_v57 = vmul.f32 %v2130_v17, %v5067_v21  ;;  %v2169_v8 = vadd.f32 %v2153_v56, %v5267_v1 }
 0x54a   : > { %v2172_v36 = vadd.f32 %v2156_v35, %v5264_v25 }
 0x54b   : > { %v2170_v51 = vadd.f32 %v2154_v57, %v5270_v12 }
 0x54c   : > { %v2180_v33 = vpack.c.bf16 %v2172_v36, %v2171_v50 }
 0x54d   : > { %v2179_v37 = vpack.c.bf16 %v2170_v51, %v2169_v8 }
 0x54f   : > { %3536 = vmatprep.mubr.bf16.mxu1 %v2179_v37 }
 0x550   : > { %3537 = vmatmul.mubr.bf16.gmra.mrb[60].mxu1 %v2180_v33 }
 0x57b   : > { %v3526_v34 = vpop.f32.mrb[48].mxu1 }
 0x57c   : > { %v2295_v21 = vadd.f32 %v3526_v34, %v5335_v9  ;;  %v2286_v24 = vpop.f32.mrb[49].mxu1 }
 0x57d   : > { %v2287_v27 = vadd.f32 %v5335_v9, %v2286_v24  ;;  %v3527_v25 = vpop.f32.mrb[50].mxu1 }
 0x57e   : > { %v2298_v1 = vadd.f32 %v3527_v25, %v5335_v9  ;;  %v2289_v62 = vpop.f32.mrb[51].mxu1  ;;  %v2351_v2 = vmax.f32 %v2295_v21, 0.0 }
 0x57f   : > { %v2290_v12 = vadd.f32 %v5335_v9, %v2289_v62  ;;  %v2349_v31 = vmax.f32 %v2287_v27, 0.0  ;;  %v3166_v27 = vld [vmem:[%s5466_s5 + $0x1] ss:$0 sm:$0xff] }
 0x580   : > { %v2352_v59 = vmax.f32 %v2298_v1, 0.0 }
 0x581   : > { %v2350_v61 = vmax.f32 %v2290_v12, 0.0 }
 0x582   : > { %v2366_v5 = vpack.c.bf16 %v2352_v59, %v2351_v2 }
 0x583   : > { %v2365_v42 = vpack.c.bf16 %v2350_v61, %v2349_v31 }
 0x585   : > { %3556 = vmatprep.mubr.bf16.mxu0 %v2365_v42 }
 0x586   : > { %3557 = vmatmul.mubr.bf16.vlgmr.msra.gmra.mrb[64].mxu0 %v2366_v5 }
 0x5b3   : > { %v3530_v26 = vpop.f32.mrb[52].mxu1 }
 0x5b4   : > { %v2311_v45 = vadd.f32 %v3530_v26, %v5335_v9  ;;  %v2302_v29 = vpop.f32.mrb[53].mxu1 }
 0x5b5   : > { %v2303_v63 = vadd.f32 %v5335_v9, %v2302_v29  ;;  %v3531_v0 = vpop.f32.mrb[54].mxu1 }
 0x5b6   : > { %v2314_v10 = vadd.f32 %v3531_v0, %v5335_v9  ;;  %v2305_v4 = vpop.f32.mrb[55].mxu1  ;;  %v2355_v20 = vmax.f32 %v2311_v45, 0.0 }
 0x5b7   : > { %v2306_v28 = vadd.f32 %v5335_v9, %v2305_v4  ;;  %v2353_v46 = vmax.f32 %v2303_v63, 0.0 }
 0x5b8   : > { %v2356_v39 = vmax.f32 %v2314_v10, 0.0 }
 0x5b9   : > { %v2354_v30 = vmax.f32 %v2306_v28, 0.0 }
 0x5ba   : > { %v2368_v47 = vpack.c.bf16 %v2356_v39, %v2355_v20 }
 0x5bb   : > { %v2367_v6 = vpack.c.bf16 %v2354_v30, %v2353_v46 }
 0x5bd   : > { %3560 = vmatprep.mubr.bf16.mxu0 %v2367_v6 }
 0x5be   : > { %3561 = vmatmul.mubr.bf16.gmra.mrb[68].mxu0 %v2368_v47 }
 0x5eb   : > { %v3534_v15 = vpop.f32.mrb[56].mxu1 }
 0x5ec   : > { %v2327_v54 = vadd.f32 %v3534_v15, %v5335_v9  ;;  %v2318_v55 = vpop.f32.mrb[57].mxu1 }
 0x5ed   : > { %v2319_v13 = vadd.f32 %v5335_v9, %v2318_v55  ;;  %v3535_v19 = vpop.f32.mrb[58].mxu1 }
 0x5ee   : > { %v2330_v58 = vadd.f32 %v3535_v19, %v5335_v9  ;;  %v2321_v22 = vpop.f32.mrb[59].mxu1  ;;  %v2359_v38 = vmax.f32 %v2327_v54, 0.0 }
 0x5ef   : > { %v2322_v48 = vadd.f32 %v5335_v9, %v2321_v22  ;;  %v2357_v60 = vmax.f32 %v2319_v13, 0.0 }
 0x5f0   : > { %v2360_v52 = vmax.f32 %v2330_v58, 0.0 }
 0x5f1   : > { %v2358_v23 = vmax.f32 %v2322_v48, 0.0 }
 0x5f2   : > { %v2370_v40 = vpack.c.bf16 %v2360_v52, %v2359_v38 }
 0x5f3   : > { %v2369_v18 = vpack.c.bf16 %v2358_v23, %v2357_v60 }
 0x5f5   : > { %3564 = vmatprep.mubr.bf16.mxu0 %v2369_v18 }
 0x5f6   : > { %3565 = vmatmul.mubr.bf16.gmra.mrb[72].mxu0 %v2370_v40 }
 0x623   : > { %v3538_v16 = vpop.f32.mrb[60].mxu1 }
 0x624   : > { %v2343_v56 = vadd.f32 %v3538_v16, %v5335_v9  ;;  %v2334_v17 = vpop.f32.mrb[61].mxu1 }
 0x625   : > { %v2335_v35 = vadd.f32 %v5335_v9, %v2334_v17  ;;  %v3539_v57 = vpop.f32.mrb[62].mxu1 }
 0x626   : > { %v2346_v50 = vadd.f32 %v3539_v57, %v5335_v9  ;;  %v2337_v36 = vpop.f32.mrb[63].mxu1  ;;  %v2363_v51 = vmax.f32 %v2343_v56, 0.0 }
 0x627   : > { %v2338_v8 = vadd.f32 %v5335_v9, %v2337_v36  ;;  %v2361_v37 = vmax.f32 %v2335_v35, 0.0 }
 0x628   : > { %v2364_v33 = vmax.f32 %v2346_v50, 0.0 }
 0x629   : > { %v2362_v34 = vmax.f32 %v2338_v8, 0.0 }
 0x62a   : > { %v2372_v21 = vpack.c.bf16 %v2364_v33, %v2363_v51  ;;  %v5359_v33 = vld [vmem:[%s5466_s5 + $0x2] ss:$0 sm:$0xff] }
 0x62b   : > { %v2371_v24 = vpack.c.bf16 %v2362_v34, %v2361_v37 }
 0x62d   : > { %3568 = vmatprep.mubr.bf16.mxu0 %v2371_v24 }
 0x62e   : > { %3569 = vmatmul.mubr.bf16.gmra.mrb[76].mxu0 %v2372_v21 }
 0x659   : > { %v3558_v25 = vpop.f32.mrb[64].mxu0 }
 0x65a   : > { %v2489_v1 = vadd.f32 %v3558_v25, %v3166_v27  ;;  %v2480_v62 = vpop.f32.mrb[65].mxu0  ;;  %v5366_v25 = vld [vmem:[%s5467_s6] ss:$0 sm:$0xff] }
 0x65b   : > { %v2481_v12 = vadd.f32 %v3166_v27, %v2480_v62  ;;  %v3559_v2 = vpop.f32.mrb[66].mxu0 }
 0x65c   : > { %v2492_v59 = vadd.f32 %v3559_v2, %v3166_v27  ;;  %v2483_v31 = vpop.f32.mrb[67].mxu0  ;;  %v2545_v61 = vmax.f32 %v2489_v1, 0.0 }
 0x65d   : > { %v2484_v9 = vadd.f32 %v3166_v27, %v2483_v31  ;;  %v2543_v42 = vmax.f32 %v2481_v12, 0.0 }
 0x65e   : > { %v2546_v5 = vmax.f32 %v2492_v59, 0.0 }
 0x65f   : > { %v2544_v43 = vmax.f32 %v2484_v9, 0.0 }
 0x660   : > { %v2560_v44 = vpack.c.bf16 %v2546_v5, %v2545_v61 }
 0x661   : > { %v2559_v32 = vpack.c.bf16 %v2544_v43, %v2543_v42 }
 0x663   : > { %3588 = vmatprep.mubr.bf16.mxu1 %v2559_v32 }
 0x664   : > { %3589 = vmatmul.mubr.bf16.vlgmr.msra.gmra.mrb[64].mxu1 %v2560_v44 }
 0x691   : > { %v3562_v26 = vpop.f32.mrb[68].mxu0 }
 0x692   : > { %v2505_v45 = vadd.f32 %v3562_v26, %v3166_v27  ;;  %v2496_v29 = vpop.f32.mrb[69].mxu0 }
 0x693   : > { %v2497_v63 = vadd.f32 %v3166_v27, %v2496_v29  ;;  %v3563_v0 = vpop.f32.mrb[70].mxu0 }
 0x694   : > { %v2508_v10 = vadd.f32 %v3563_v0, %v3166_v27  ;;  %v2499_v4 = vpop.f32.mrb[71].mxu0  ;;  %v2549_v28 = vmax.f32 %v2505_v45, 0.0 }
 0x695   : > { %v2500_v41 = vadd.f32 %v3166_v27, %v2499_v4  ;;  %v2547_v39 = vmax.f32 %v2497_v63, 0.0 }
 0x696   : > { %v2550_v20 = vmax.f32 %v2508_v10, 0.0 }
 0x697   : > { %v2548_v46 = vmax.f32 %v2500_v41, 0.0 }
 0x698   : > { %v2562_v30 = vpack.c.bf16 %v2550_v20, %v2549_v28 }
 0x699   : > { %v2561_v47 = vpack.c.bf16 %v2548_v46, %v2547_v39 }
 0x69b   : > { %3592 = vmatprep.mubr.bf16.mxu1 %v2561_v47 }
 0x69c   : > { %3593 = vmatmul.mubr.bf16.gmra.mrb[68].mxu1 %v2562_v30 }
 0x6c9   : > { %v3566_v49 = vpop.f32.mrb[72].mxu0 }
 0x6ca   : > { %v2521_v6 = vadd.f32 %v3566_v49, %v3166_v27  ;;  %v2512_v11 = vpop.f32.mrb[73].mxu0 }
 0x6cb   : > { %v2513_v14 = vadd.f32 %v3166_v27, %v2512_v11  ;;  %v3567_v53 = vpop.f32.mrb[74].mxu0 }
 0x6cc   : > { %v2524_v15 = vadd.f32 %v3567_v53, %v3166_v27  ;;  %v2515_v54 = vpop.f32.mrb[75].mxu0  ;;  %v2553_v13 = vmax.f32 %v2521_v6, 0.0 }
 0x6cd   : > { %v2516_v55 = vadd.f32 %v3166_v27, %v2515_v54  ;;  %v2551_v58 = vmax.f32 %v2513_v14, 0.0 }
 0x6ce   : > { %v2554_v19 = vmax.f32 %v2524_v15, 0.0 }
 0x6cf   : > { %v2552_v22 = vmax.f32 %v2516_v55, 0.0 }
 0x6d0   : > { %v2564_v48 = vpack.c.bf16 %v2554_v19, %v2553_v13 }
 0x6d1   : > { %v2563_v38 = vpack.c.bf16 %v2552_v22, %v2551_v58 }
 0x6d3   : > { %3596 = vmatprep.mubr.bf16.mxu1 %v2563_v38 }
 0x6d4   : > { %3597 = vmatmul.mubr.bf16.gmra.mrb[72].mxu1 %v2564_v48 }
 0x701   : > { %v3570_v52 = vpop.f32.mrb[76].mxu0 }
 0x702   : > { %v2537_v60 = vadd.f32 %v3570_v52, %v3166_v27  ;;  %v2528_v23 = vpop.f32.mrb[77].mxu0 }
 0x703   : > { %v2529_v40 = vadd.f32 %v3166_v27, %v2528_v23  ;;  %v3571_v18 = vpop.f32.mrb[78].mxu0 }
 0x704   : > { %v2540_v16 = vadd.f32 %v3571_v18, %v3166_v27  ;;  %v2531_v56 = vpop.f32.mrb[79].mxu0  ;;  %v2557_v35 = vmax.f32 %v2537_v60, 0.0 }
 0x705   : > { %v2532_v17 = vadd.f32 %v3166_v27, %v2531_v56  ;;  %v2555_v50 = vmax.f32 %v2529_v40, 0.0 }
 0x706   : > { %v2558_v57 = vmax.f32 %v2540_v16, 0.0 }
 0x707   : > { %v2556_v36 = vmax.f32 %v2532_v17, 0.0 }
 0x708   : > { %v2566_v8 = vpack.c.bf16 %v2558_v57, %v2557_v35 }
 0x709   : > { %v2565_v51 = vpack.c.bf16 %v2556_v36, %v2555_v50 }
 0x70b   : > { %3600 = vmatprep.mubr.bf16.mxu1 %v2565_v51 }
 0x70c   : > { %3601 = vmatmul.mubr.bf16.gmra.mrb[76].mxu1 %v2566_v8 }
 0x737   : > { %v3590_v37 = vpop.f32.mrb[64].mxu1 }
 0x738   : > { %v2683_v34 = vadd.f32 %v3590_v37, %v5359_v33  ;;  %v2674_v21 = vpop.f32.mrb[65].mxu1 }
 0x739   : > { %v2675_v24 = vadd.f32 %v5359_v33, %v2674_v21  ;;  %v3591_v27 = vpop.f32.mrb[66].mxu1 }
 0x73a   : > { %v2739_v1 = vmax.f32 %v2683_v34, 0.0  ;;  %v2677_v62 = vpop.f32.mrb[67].mxu1  ;;  %v2686_v59 = vadd.f32 %v3591_v27, %v5359_v33 }
 0x73b   : > { %v2678_v12 = vadd.f32 %v5359_v33, %v2677_v62  ;;  %v2737_v2 = vmax.f32 %v2675_v24, 0.0 }
 0x73c   : > { %v2761_v31 = vmul.f32 %v5366_v25, %v2739_v1  ;;  %v2740_v5 = vmax.f32 %v2686_v59, 0.0  ;;  %v5400_v59 = vshrl.u32 %v354_v3, 7 }
 0x73d   : > { %v2738_v9 = vmax.f32 %v2678_v12, 0.0  ;;  %v2759_v42 = vmul.f32 %v5366_v25, %v2737_v2  ;;  %v2844_v12 = vadd.s32 4294967288, %v4224_v7 }
 0x73e   : > { %2779 = vadd.xlane.f32.xlu0 %v2761_v31  ;;  %v2762_v43 = vmul.f32 %v5366_v25, %v2740_v5  ;;  %v5402_v31 = vstv %s337_s10 }
 0x73f   : > { %v2760_v61 = vmul.f32 %v5366_v25, %v2738_v9  ;;  %v2851_v9 = vadd.s32 4294967280, %v4224_v7 }
 0x741   : > { %2777 = vadd.xlane.f32.xlu1 %v2760_v61  ;;  %v2858_v61 = vadd.s32 4294967272, %v4224_v7 }
 0x742   : > { %2775 = vadd.xlane.f32.xlu0 %v2759_v42 }
 0x746   : > { %2781 = vadd.xlane.f32.xlu0 %v2762_v43  ;;  %v2842_v43 = vsub.s32 %v4224_v7, %v5400_v59 }
 0x76f   : > { %v3594_v44 = vpop.f32.mrb[68].mxu1 }
 0x770   : > { %v2699_v32 = vadd.f32 %v3594_v44, %v5359_v33  ;;  %v2690_v26 = vpop.f32.mrb[69].mxu1 }
 0x771   : > { %v2691_v45 = vadd.f32 %v5359_v33, %v2690_v26  ;;  %v3595_v29 = vpop.f32.mrb[70].mxu1  ;;  %v2854_v26 = vsub.s32 %v2851_v9, %v5400_v59 }
 0x772   : > { %v2743_v63 = vmax.f32 %v2699_v32, 0.0  ;;  %v2702_v0 = vadd.f32 %v3595_v29, %v5359_v33  ;;  %v2693_v10 = vpop.f32.mrb[71].mxu1  ;;  %v2865_v32 = vadd.s32 4294967264, %v4224_v7 }
 0x773   : > { %v2694_v4 = vadd.f32 %v5359_v33, %v2693_v10  ;;  %v2741_v41 = vmax.f32 %v2691_v45, 0.0  ;;  %v2861_v45 = vsub.s32 %v2858_v61, %v5400_v59  ;;  %v2872_v10 = vadd.s32 4294967256, %v4224_v7 }
 0x774   : > { %v2744_v28 = vmax.f32 %v2702_v0, 0.0  ;;  %v2765_v20 = vmul.f32 %v5366_v25, %v2743_v63 }
 0x775   : > { %v2742_v39 = vmax.f32 %v2694_v4, 0.0  ;;  %v2763_v30 = vmul.f32 %v5366_v25, %v2741_v41  ;;  %v2868_v41 = vsub.s32 %v2865_v32, %v5400_v59 }
 0x776   : > { %2787 = vadd.xlane.f32.xlu1 %v2765_v20  ;;  %v2766_v46 = vmul.f32 %v5366_v25, %v2744_v28 }
 0x777   : > { %v2764_v47 = vmul.f32 %v5366_v25, %v2742_v39 }
 0x778   : > { %2789 = vadd.xlane.f32.xlu0 %v2766_v46 }
 0x77a   : > { %2783 = vadd.xlane.f32.xlu1 %v2763_v30 }
 0x77c   : > { %2785 = vadd.xlane.f32.xlu0 %v2764_v47  ;;  %v2875_v47 = vsub.s32 %v2872_v10, %v5400_v59 }
 0x7a7   : > { %v3598_v49 = vpop.f32.mrb[72].mxu1 }
 0x7a8   : > { %v2715_v6 = vadd.f32 %v3598_v49, %v5359_v33  ;;  %v2706_v11 = vpop.f32.mrb[73].mxu1 }
 0x7a9   : > { %v2707_v14 = vadd.f32 %v5359_v33, %v2706_v11  ;;  %v3599_v53 = vpop.f32.mrb[74].mxu1  ;;  %v2879_v11 = vadd.s32 4294967248, %v4224_v7 }
 0x7aa   : > { %v2747_v15 = vmax.f32 %v2715_v6, 0.0  ;;  %v2718_v54 = vadd.f32 %v3599_v53, %v5359_v33  ;;  %v2709_v55 = vpop.f32.mrb[75].mxu1 }
 0x7ab   : > { %v2710_v13 = vadd.f32 %v5359_v33, %v2709_v55  ;;  %v2745_v19 = vmax.f32 %v2707_v14, 0.0 }
 0x7ac   : > { %v2748_v58 = vmax.f32 %v2718_v54, 0.0  ;;  %v2769_v22 = vmul.f32 %v5366_v25, %v2747_v15  ;;  %v2893_v54 = vadd.s32 4294967232, %v4224_v7 }
 0x7ad   : > { %v2746_v48 = vmax.f32 %v2710_v13, 0.0  ;;  %v2767_v52 = vmul.f32 %v5366_v25, %v2745_v19  ;;  %v2886_v13 = vadd.s32 4294967240, %v4224_v7 }
 0x7ae   : > { %2795 = vadd.xlane.f32.xlu1 %v2769_v22  ;;  %v2770_v38 = vmul.f32 %v5366_v25, %v2748_v58  ;;  %v2882_v22 = vsub.s32 %v2879_v11, %v5400_v59 }
 0x7af   : > { %v2768_v60 = vmul.f32 %v5366_v25, %v2746_v48 }
 0x7b0   : > { %2797 = vadd.xlane.f32.xlu0 %v2770_v38 }
 0x7b2   : > { %2791 = vadd.xlane.f32.xlu1 %v2767_v52  ;;  %v2900_v52 = vadd.s32 4294967224, %v4224_v7 }
 0x7b4   : > { %2793 = vadd.xlane.f32.xlu0 %v2768_v60  ;;  %v2896_v60 = vsub.s32 %v2893_v54, %v5400_v59 }
 0x7cb   : > { %v2780_v27 = vpop.xlane.xlu0 %2779 }
 0x7cc   : > { %v2810_v4 = vadd.f32 %v5402_v31, %v2780_v27 }
 0x7ce   : > { %v2778_v62 = vpop.xlane.xlu1 %2777  ;;  %v2855_v6 = vrot.slane %v2810_v4, %v2854_v26 }
 0x7cf   : > { %v2776_v1 = vpop.xlane.xlu0 %2775  ;;  %v2809_v42 = vadd.f32 %v5402_v31, %v2778_v62  ;;  %v2921_v62 = vadd.s32 4294967200, %v4224_v7 }
 0x7d0   : > { %v2808_v44 = vadd.f32 %v5402_v31, %v2776_v1 }
 0x7d2   : > { %v2843_v63 = vrot.slane %v2808_v44, %v2842_v43 }
 0x7df   : > { %v3602_v23 = vpop.f32.mrb[76].mxu1 }
 0x7e0   : > { %v2722_v40 = vpop.f32.mrb[77].mxu1  ;;  %v2731_v18 = vadd.f32 %v3602_v23, %v5359_v33 }
 0x7e1   : > { %v2723_v16 = vadd.f32 %v5359_v33, %v2722_v40  ;;  %v3603_v56 = vpop.f32.mrb[78].mxu1 }
 0x7e2   : > { %v2725_v17 = vpop.f32.mrb[79].mxu1  ;;  %v2734_v57 = vadd.f32 %v3603_v56, %v5359_v33  ;;  %v2751_v36 = vmax.f32 %v2731_v18, 0.0  ;;  %v2889_v18 = vsub.s32 %v2886_v13, %v5400_v59 }
 0x7e3   : > { %v2749_v35 = vmax.f32 %v2723_v16, 0.0  ;;  %v2726_v50 = vadd.f32 %v5359_v33, %v2725_v17  ;;  %v2782_v33 = vpop.xlane.xlu0 %2781 }
 0x7e4   : > { %v2752_v37 = vmax.f32 %v2734_v57, 0.0  ;;  %v2773_v21 = vmul.f32 %v5366_v25, %v2751_v36  ;;  %v2811_v0 = vadd.f32 %v5402_v31, %v2782_v33  ;;  %v2903_v57 = vsub.s32 %v2900_v52, %v5400_v59 }
 0x7e5   : > { %v2750_v8 = vmax.f32 %v2726_v50, 0.0  ;;  %v2771_v51 = vmul.f32 %v5366_v25, %v2749_v35  ;;  %v2907_v35 = vadd.s32 4294967216, %v4224_v7  ;;  %v2928_v33 = vadd.s32 4294967192, %v4224_v7 }
 0x7e6   : > { %v2774_v24 = vmul.f32 %v5366_v25, %v2752_v37  ;;  %v2862_v30 = vrot.slane %v2811_v0, %v2861_v45 }
 0x7e7   : > { %2799 = vadd.xlane.f32.xlu1 %v2771_v51  ;;  %v2772_v34 = vmul.f32 %v5366_v25, %v2750_v8  ;;  %v2847_v25 = vsub.s32 %v2844_v12, %v5400_v59  ;;  %v2910_v37 = vsub.s32 %v2907_v35, %v5400_v59  ;;  %v2931_v32 = vsub.s32 %v2928_v33, %v5400_v59 }
 0x7e9   : > { %2801 = vadd.xlane.f32.xlu0 %v2772_v34  ;;  %v2848_v29 = vrot.slane %v2809_v42, %v2847_v25  ;;  %v2914_v34 = vadd.s32 4294967208, %v4224_v7  ;;  %v2935_v25 = vadd.s32 4294967184, %v4224_v7 }
 0x7eb   : > { %2803 = vadd.xlane.f32.xlu1 %v2773_v21  ;;  %v2850_v46 = vsel %vm2849_vm11, %v2848_v29, %v2843_v63  ;;  %v2917_v12 = vsub.s32 %v2914_v34, %v5400_v59  ;;  %v2938_v0 = vsub.s32 %v2935_v25, %v5400_v59 }
 0x7ec   : > { %v2857_v15 = vsel %vm2856_vm8, %v2855_v6, %v2850_v46 }
 0x7ed   : > { %2805 = vadd.xlane.f32.xlu0 %v2774_v24  ;;  %v2864_v55 = vsel %vm2863_vm14, %v2862_v30, %v2857_v15 }
 0x803   : > { %v2788_v2 = vpop.xlane.xlu1 %2787 }
 0x804   : > { %v2814_v48 = vadd.f32 %v5402_v31, %v2788_v2 }
 0x805   : > { %v2790_v5 = vpop.xlane.xlu0 %2789 }
 0x806   : > { %v2815_v16 = vadd.f32 %v5402_v31, %v2790_v5  ;;  %v2883_v17 = vrot.slane %v2814_v48, %v2882_v22  ;;  %v2924_v5 = vsub.s32 %v2921_v62, %v5400_v59 }
 0x807   : > { %v2784_v3 = vpop.xlane.xlu1 %2783 }
 0x808   : > { %v2812_v28 = vadd.f32 %v5402_v31, %v2784_v3  ;;  %v2890_v51 = vrot.slane %v2815_v16, %v2889_v18  ;;  %v2942_v3 = vadd.s32 4294967176, %v4224_v7 }
 0x809   : > { %v2786_v20 = vpop.xlane.xlu0 %2785 }
 0x80a   : > { %v2813_v49 = vadd.f32 %v5402_v31, %v2786_v20  ;;  %v2869_v14 = vrot.slane %v2812_v28, %v2868_v41 }
 0x80c   : > { %v2876_v19 = vrot.slane %v2813_v49, %v2875_v47  ;;  %v2871_v38 = vsel %vm2870_vm9, %v2869_v14, %v2864_v55 }
 0x80e   : > { %v2878_v56 = vsel %vm2877_vm7, %v2876_v19, %v2871_v38 }
 0x80f   : > { %v2885_v36 = vsel %vm2884_vm10, %v2883_v17, %v2878_v56 }
 0x810   : > { %v2892_v21 = vsel %vm2891_vm15, %v2890_v51, %v2885_v36 }
 0x83b   : > { %v2796_v39 = vpop.xlane.xlu1 %2795 }
 0x83c   : > { %v2818_v27 = vadd.f32 %v5402_v31, %v2796_v39  ;;  %v2945_v39 = vsub.s32 %v2942_v3, %v5400_v59 }
 0x83d   : > { %v2798_v53 = vpop.xlane.xlu0 %2797 }
 0x83e   : > { %v2819_v2 = vadd.f32 %v5402_v31, %v2798_v53  ;;  %v2911_v61 = vrot.slane %v2818_v27, %v2910_v37 }
 0x83f   : > { %v2792_v58 = vpop.xlane.xlu1 %2791 }
 0x840   : > { %v2816_v23 = vadd.f32 %v5402_v31, %v2792_v58  ;;  %v2918_v26 = vrot.slane %v2819_v2, %v2917_v12 }
 0x841   : > { %v2794_v40 = vpop.xlane.xlu0 %2793 }
 0x842   : > { %v2817_v50 = vadd.f32 %v5402_v31, %v2794_v40  ;;  %v2897_v8 = vrot.slane %v2816_v23, %v2896_v60 }
 0x844   : > { %v2904_v24 = vrot.slane %v2817_v50, %v2903_v57  ;;  %v2899_v1 = vsel %vm2898_vm6, %v2897_v8, %v2892_v21 }
 0x846   : > { %v2906_v9 = vsel %vm2905_vm4, %v2904_v24, %v2899_v1 }
 0x847   : > { %v2913_v43 = vsel %vm2912_vm5, %v2911_v61, %v2906_v9 }
 0x848   : > { %v2920_v10 = vsel %vm2919_vm1, %v2918_v26, %v2913_v43 }
 0x874   : > { %v2800_v42 = vpop.xlane.xlu1 %2799 }
 0x875   : > { %v2820_v44 = vadd.f32 %v5402_v31, %v2800_v42 }
 0x876   : > { %v2802_v45 = vpop.xlane.xlu0 %2801 }
 0x877   : > { %v2925_v29 = vrot.slane %v2820_v44, %v2924_v5  ;;  %v2821_v63 = vadd.f32 %v5402_v31, %v2802_v45 }
 0x878   : > { %v2804_v4 = vpop.xlane.xlu1 %2803 }
 0x879   : > { %v2927_v41 = vsel %vm2926_vm13, %v2925_v29, %v2920_v10  ;;  %v2932_v28 = vrot.slane %v2821_v63, %v2931_v32  ;;  %v2822_v20 = vadd.f32 %v5402_v31, %v2804_v4 }
 0x87a   : > { %v2806_v7 = vpop.xlane.xlu0 %2805 }
 0x87b   : > { %v2934_v46 = vsel %vm2933_vm12, %v2932_v28, %v2927_v41  ;;  %v2939_v30 = vrot.slane %v2822_v20, %v2938_v0  ;;  %v2823_v47 = vadd.f32 %v5402_v31, %v2806_v7 }
 0x87d   : > { %v2941_v49 = vsel %vm2940_vm0, %v2939_v30, %v2934_v46  ;;  %v2946_v6 = vrot.slane %v2823_v47, %v2945_v39 }
 0x87f   : > { %v2948_v11 = vsel %vm2947_vm2, %v2946_v6, %v2941_v49 }
 0x880   : > { %2950 = vst [vmem:[%s334_s20] sm:$0x1] %v2948_v11 }
 0x881 PF: > { %s21_s29 = sadd.s32 1, %s3830_s29  }
 0x882   : > { %p18_p10 = scmp.ge.s32.totalorder %s21_s29, 4  }
 0x884   :  { %20 = sbr.rel (!%p18_p10) target bundleno = 4 (0x4), region = 99 }
 0x88b   :  { %2968 = vsyncpa [#allocation4], 1 }
 0x88c   :  { %2970 = vsyncpa [#allocation4 + $0x1], 1 }
 0x88d   :  { %2971 = vsyncpa [#allocation6], 1 }

</bundles_post_ra>
